<compile_context>
chip_gen: v5e
topology: v5e:2x2
jax: 0.10.0
libtpu: 0.0.40
codegen_flags: <defaults>
</compile_context>

<pallas_src>
import functools

import numpy as np
import jax
import jax.numpy as jnp
from jax.experimental import pallas as pl
from jax.experimental.pallas import tpu as pltpu

BN_EPS = 1e-5


def sin_pe_mask(pe_op, pe_t, pe_alpha, pe_ratio, n_hidden):
    """JAX port of sin_pe_func (returns a (1, n_hidden) float32 mask)."""
    idx = jnp.arange(n_hidden, dtype=jnp.float32) / n_hidden
    mask = jnp.sin(2.0 * np.pi * idx * pe_t)
    if pe_op == 'add':
        mask = pe_alpha * mask
    elif pe_op == 'mul':
        mask = pe_alpha * mask + 1.0
    n = int(pe_ratio * n_hidden)
    if pe_op == 'add':
        mask = mask.at[n:].set(0.0)
    elif pe_op == 'mul':
        mask = mask.at[n:].set(1.0)
    return mask.reshape(1, n_hidden).astype(jnp.float32)


# ----------------------------------------------------------------------------------
# Kernel
# ----------------------------------------------------------------------------------
def _pe_block_body(xpad_ref, band1_ref, g1_ref, b1_ref, pe1_ref,
                   band2_ref, g2_ref, b2_ref, pe2_ref,
                   fold_ref, unfold_ref, scband_ref,
                   o_ref, pad2_ref, *, pe_op):
    """Whole PEBasicBlock forward (stride=1, sc_mat shortcut) on one TensorCore.

    xpad_ref : (B, H+2, W*C)  row-halo'd input, lane-dense (lane = x*C + c)
    band*    : (3, W*Cin, W*Cout)  banded conv weights (dx taps + x-padding baked in)
    g/b/pe   : (1, W*C)  BN affine params / PE masks, pre-tiled onto lanes
    fold     : (W*C, C)  lane -> channel summation matrix
    unfold   : (C, W*C)  channel -> lane broadcast matrix
    scband   : (W*C, W*C) block-diag sc_mat.T, or None when sc_mat == I
    o_ref    : (B*H, W*C)  lane-dense output slab
    pad2_ref : (B, H+2, W*C) VMEM scratch holding relu(y1) with a 1-row halo
    """
    B, Hp, WC = xpad_ref.shape
    H = Hp - 2
    BH = B * H
    C = fold_ref.shape[1]
    W = WC // C
    inv_n = 1.0 / float(BH * W)          # 1 / (B*H*W) per-channel count

    def conv(src_ref, band_ref):
        # dy taps are plain row slices of the halo'd buffer; dx taps + x zero
        # padding are inside the banded weight, so each tap is one dense matmul.
        rows = [src_ref[:, dy:dy + H, :].reshape(BH, WC) for dy in range(3)]
        acc = jnp.dot(rows[0], band_ref[0], preferred_element_type=jnp.float32)
        acc = acc + jnp.dot(rows[1], band_ref[1], preferred_element_type=jnp.float32)
        acc = acc + jnp.dot(rows[2], band_ref[2], preferred_element_type=jnp.float32)
        return acc, rows

    def bn_pe(acc, g_ref, b_ref, pe_ref):
        # Training-mode batch statistics over (B, H, W) per channel.
        row_sum = jnp.sum(acc, axis=0, keepdims=True)                     # (1, W*C)
        mean_c = jnp.dot(row_sum, fold_ref[...],
                         preferred_element_type=jnp.float32) * inv_n      # (1, C)
        mean = jnp.dot(mean_c, unfold_ref[...],
                       preferred_element_type=jnp.float32)                # (1, W*C)
        centered = acc - mean
        sq_sum = jnp.sum(centered * centered, axis=0, keepdims=True)      # (1, W*C)
        var_c = jnp.dot(sq_sum, fold_ref[...],
                        preferred_element_type=jnp.float32) * inv_n       # (1, C)
        inv_std = jnp.dot(jax.lax.rsqrt(var_c + BN_EPS), unfold_ref[...],
                          preferred_element_type=jnp.float32)             # (1, W*C)
        y = centered * inv_std * g_ref[...] + b_ref[...]
        if pe_op == 'add':
            y = y + pe_ref[...]
        else:  # 'mul'
            y = y * pe_ref[...]
        return y

    # ---- conv1 + bn1 + pe1 + relu -------------------------------------------------
    acc1, rows1 = conv(xpad_ref, band1_ref)
    y1 = jnp.maximum(bn_pe(acc1, g1_ref, b1_ref, pe1_ref), 0.0)

    # ---- stash relu(y1) into the row-halo scratch (only halo rows are zeroed) ------
    zero_row = jnp.zeros((B, 1, WC), pad2_ref.dtype)
    pad2_ref[:, 0:1, :] = zero_row
    pad2_ref[:, H + 1:H + 2, :] = zero_row
    pad2_ref[:, 1:H + 1, :] = y1.astype(pad2_ref.dtype).reshape(B, H, WC)

    # ---- conv2 + bn2 + pe2 ----------------------------------------------------------
    acc2, _ = conv(pad2_ref, band2_ref)
    y2 = bn_pe(acc2, g2_ref, b2_ref, pe2_ref)

    # ---- shortcut: torch.mm(sc_mat, x_flat) == x @ sc_mat.T -------------------------
    # Reuse the dy=1 center slab already loaded for conv1.
    x_center = rows1[1]
    if scband_ref is None:          # identity sc_mat -> skip the matmul entirely
        sc = x_center.astype(jnp.float32)
    else:
        sc = jnp.dot(x_center, scband_ref[...], preferred_element_type=jnp.float32)

    o_ref[...] = jnp.maximum(y2 + sc, 0.0)


def _make_kernel(pe_op, identity_sc):
    if identity_sc:
        def kernel(xpad, band1, g1, b1, pe1, band2, g2, b2, pe2, fold, unfold,
                   o_ref, pad2_ref):
            _pe_block_body(xpad, band1, g1, b1, pe1, band2, g2, b2, pe2,
                           fold, unfold, None, o_ref, pad2_ref, pe_op=pe_op)
    else:
        def kernel(xpad, band1, g1, b1, pe1, band2, g2, b2, pe2, fold, unfold,
                   scband, o_ref, pad2_ref):
            _pe_block_body(xpad, band1, g1, b1, pe1, band2, g2, b2, pe2,
                           fold, unfold, scband, o_ref, pad2_ref, pe_op=pe_op)
    return kernel


# ----------------------------------------------------------------------------------
# Parameter setup glue (runs once on host / plain JAX)
# ----------------------------------------------------------------------------------
def _banded_conv_weight(w_hwio, W):
    """Banded block matrix for a 3x3 stride-1 pad-1 conv in the (x*C + c) lane layout.

    band[dy][xin*Cin + ci, xout*Cout + co] = w[dy, dx, ci, co] with dx = xin - xout + 1
    (entries for xin outside [0, W) simply don't exist -> zero x-padding for free).
    """
    kh, kw, Cin, Cout = w_hwio.shape
    bands = []
    for dy in range(kh):
        band = jnp.zeros((W * Cin, W * Cout), jnp.float32)
        for dx in range(kw):
            band = band + jnp.kron(jnp.eye(W, k=1 - dx, dtype=jnp.float32),
                                   w_hwio[dy, dx].astype(jnp.float32))
        bands.append(band)
    return jnp.stack(bands)       # (3, W*Cin, W*Cout)


def pe_basic_block_forward(x_nhwc, params, pe_op, compute_dtype=jnp.bfloat16):
    """Wrapper: layout/parameter prep (glue) + the fused Pallas kernel."""
    B, H, W, Cin = x_nhwc.shape
    C = params['w1'].shape[-1]
    assert Cin == C, "sc_mat shortcut path requires stride=1 and in_planes == planes"
    WC = W * C

    # Lane-dense layout (B, H, W*C); 1-row halo only (dx padding is in the weights).
    xpad = jnp.pad(x_nhwc.reshape(B, H, WC), ((0, 0), (1, 1), (0, 0)))
    xpad = xpad.astype(compute_dtype)

    band1 = _banded_conv_weight(params['w1'], W).astype(compute_dtype)
    band2 = _banded_conv_weight(params['w2'], W).astype(compute_dtype)

    eye_c = jnp.eye(C, dtype=jnp.float32)
    fold = jnp.tile(eye_c, (W, 1))        # (W*C, C)
    unfold = jnp.tile(eye_c, (1, W))      # (C, W*C)

    def lane_tile(v):
        return jnp.tile(jnp.asarray(v, jnp.float32).reshape(1, C), (1, W))

    g1, b1, pe1 = lane_tile(params['g1']), lane_tile(params['b1']), lane_tile(params['pe1'])
    g2, b2, pe2 = lane_tile(params['g2']), lane_tile(params['b2']), lane_tile(params['pe2'])

    sc_mat_t = np.asarray(params['sc_mat_t'], np.float32)
    identity_sc = bool(np.array_equal(sc_mat_t, np.eye(C, dtype=np.float32)))

    operands = [xpad, band1, g1, b1, pe1, band2, g2, b2, pe2, fold, unfold]
    if not identity_sc:
        # block-diagonal (per-pixel) sc_mat.T in the lane-dense layout
        scband = jnp.kron(jnp.eye(W, dtype=jnp.float32),
                          jnp.asarray(sc_mat_t)).astype(compute_dtype)
        operands.append(scband)

    vmem = pl.BlockSpec(memory_space=pltpu.MemorySpace.VMEM)
    out = pl.pallas_call(
        _make_kernel(pe_op, identity_sc),
        out_shape=jax.ShapeDtypeStruct((B * H, WC), jnp.float32),
        in_specs=[vmem] * len(operands),
        out_specs=vmem,
        scratch_shapes=[pltpu.VMEM((B, H + 2, WC), compute_dtype)],
    )(*operands)
    return out.reshape(B, H, W, C)


# ----------------------------------------------------------------------------------
# Pure-JAX reference (module-faithful, f32) for verification
# ----------------------------------------------------------------------------------
def reference_forward(x_nhwc, params, pe_op):
    hi = jax.lax.Precision.HIGHEST

    def conv3x3(x, w):
        return jax.lax.conv_general_dilated(
            x, w, window_strides=(1, 1), padding=((1, 1), (1, 1)),
            dimension_numbers=('NHWC', 'HWIO', 'NHWC'), precision=hi)

    def bn(y, g, b):
        mu = jnp.mean(y, axis=(0, 1, 2), keepdims=True)
        var = jnp.mean((y - mu) ** 2, axis=(0, 1, 2), keepdims=True)
        return ((y - mu) * jax.lax.rsqrt(var + BN_EPS) * g.reshape(1, 1, 1, -1)
                + b.reshape(1, 1, 1, -1))

    pe1 = params['pe1'].reshape(1, 1, 1, -1)
    pe2 = params['pe2'].reshape(1, 1, 1, -1)
    y1 = bn(conv3x3(x_nhwc, params['w1']), params['g1'], params['b1'])
    y1 = y1 + pe1 if pe_op == 'add' else y1 * pe1
    y1 = jnp.maximum(y1, 0.0)
    y2 = bn(conv3x3(y1, params['w2']), params['g2'], params['b2'])
    y2 = y2 + pe2 if pe_op == 'add' else y2 * pe2
    sc = jnp.einsum('bhwc,ck->bhwk', x_nhwc, params['sc_mat_t'], precision=hi)
    return jnp.maximum(y2 + sc, 0.0)


if __name__ == "__main__":
    # PEBasicBlock(pe_way='sin', pe_t=4.0, pe_alpha=0.5, pe_op='add', pe_ratio=0.5,
    #              in_planes=16, planes=16, stride=1)  -> sc=False (sc_mat shortcut)
    pe_t, pe_alpha, pe_op, pe_ratio = 4.0, 0.5, 'add', 0.5
    in_planes = planes = 16
    B, H, W = 2, 16, 16

    key = jax.random.PRNGKey(0)
    k_x, k_w1, k_w2, k_g1, k_b1, k_g2, k_b2 = jax.random.split(key, 7)

    w1 = jax.random.normal(k_w1, (3, 3, in_planes, planes), jnp.float32) * np.sqrt(
        2.0 / (9 * in_planes))
    w2 = jax.random.normal(k_w2, (3, 3, planes, planes), jnp.float32) * np.sqrt(
        2.0 / (9 * planes))
    params = dict(
        w1=w1,
        g1=1.0 + 0.1 * jax.random.normal(k_g1, (1, planes), jnp.float32),
        b1=0.1 * jax.random.normal(k_b1, (1, planes), jnp.float32),
        pe1=sin_pe_mask(pe_op, pe_t, pe_alpha, pe_ratio, planes),
        w2=w2,
        g2=1.0 + 0.1 * jax.random.normal(k_g2, (1, planes), jnp.float32),
        b2=0.1 * jax.random.normal(k_b2, (1, planes), jnp.float32),
        pe2=sin_pe_mask(pe_op, pe_t, pe_alpha, pe_ratio, planes),
        # torch.diag(torch.ones(planes)), transposed (identity -> same matrix)
        sc_mat_t=jnp.eye(planes, dtype=jnp.float32),
    )

    x_nchw = jax.random.normal(k_x, (B, in_planes, H, W), jnp.float32)   # PyTorch NCHW
    x_nhwc = jnp.transpose(x_nchw, (0, 2, 3, 1))                         # kernel layout

    ref = jax.block_until_ready(reference_forward(x_nhwc, params, pe_op))

    # 1) f32 MXU-operand path (identity shortcut), tight-ish check
    out_f32 = jax.block_until_ready(
        pe_basic_block_forward(x_nhwc, params, pe_op, compute_dtype=jnp.float32))
    np.testing.assert_allclose(np.asarray(out_f32), np.asarray(ref),
                               rtol=2e-2, atol=2e-2)

    # 2) bf16 MXU-operand path (v6e/v7x recommendation); epilogue stays f32,
    #    so only bf16 operand rounding differs from the f32 reference.
    out_bf16 = jax.block_until_ready(
        pe_basic_block_forward(x_nhwc, params, pe_op, compute_dtype=jnp.bfloat16))
    np.testing.assert_allclose(np.asarray(out_bf16), np.asarray(ref),
                               rtol=1e-1, atol=1e-1)

    # 3) general (non-identity) sc_mat path, e.g. after shuffle() permutes sc_mat
    perm = np.random.RandomState(0).permutation(planes)
    sc_mat = np.eye(planes, dtype=np.float32)[perm]
    params_p = dict(params, sc_mat_t=jnp.asarray(sc_mat.T))
    out_p = jax.block_until_ready(
        pe_basic_block_forward(x_nhwc, params_p, pe_op, compute_dtype=jnp.float32))
    ref_p = jax.block_until_ready(reference_forward(x_nhwc, params_p, pe_op))
    np.testing.assert_allclose(np.asarray(out_p), np.asarray(ref_p),
                               rtol=2e-2, atol=2e-2)

    print("KERNEL_OK")
</pallas_src>

<mosaic_0001>
module attributes {stable_mosaic.version = 11 : i64} {
  func.func @kernel(%arg0: memref<2x18x256xf32, #tpu.memory_space<vmem>>, %arg1: memref<3x256x256xf32, #tpu.memory_space<vmem>>, %arg2: memref<1x256xf32, #tpu.memory_space<vmem>>, %arg3: memref<1x256xf32, #tpu.memory_space<vmem>>, %arg4: memref<1x256xf32, #tpu.memory_space<vmem>>, %arg5: memref<3x256x256xf32, #tpu.memory_space<vmem>>, %arg6: memref<1x256xf32, #tpu.memory_space<vmem>>, %arg7: memref<1x256xf32, #tpu.memory_space<vmem>>, %arg8: memref<1x256xf32, #tpu.memory_space<vmem>>, %arg9: memref<256x16xf32, #tpu.memory_space<vmem>>, %arg10: memref<16x256xf32, #tpu.memory_space<vmem>>, %arg11: memref<32x256xf32, #tpu.memory_space<vmem>>, %arg12: memref<2x18x256xf32, #tpu.memory_space<vmem>>) attributes {dimension_semantics = [], scalar_prefetch = 0 : i64, scratch_operands = 1 : i64, tpu.core_type = #tpu.core_type<tc>} {
    %c0 = arith.constant 0 : index
    %c0_0 = arith.constant 0 : index
    %c0_1 = arith.constant 0 : index
    %0 = vector.load %arg0[%c0, %c0_0, %c0_1] : memref<2x18x256xf32, #tpu.memory_space<vmem>>, vector<2x16x256xf32>
    %1 = vector.shape_cast %0 : vector<2x16x256xf32> to vector<32x256xf32>
    %c0_2 = arith.constant 0 : index
    %c1 = arith.constant 1 : index
    %c0_3 = arith.constant 0 : index
    %2 = vector.load %arg0[%c0_2, %c1, %c0_3] : memref<2x18x256xf32, #tpu.memory_space<vmem>>, vector<2x16x256xf32>
    %3 = vector.shape_cast %2 : vector<2x16x256xf32> to vector<32x256xf32>
    %c0_4 = arith.constant 0 : index
    %c2 = arith.constant 2 : index
    %c0_5 = arith.constant 0 : index
    %4 = vector.load %arg0[%c0_4, %c2, %c0_5] : memref<2x18x256xf32, #tpu.memory_space<vmem>>, vector<2x16x256xf32>
    %5 = vector.shape_cast %4 : vector<2x16x256xf32> to vector<32x256xf32>
    %c0_6 = arith.constant 0 : index
    %c0_7 = arith.constant 0 : index
    %c0_8 = arith.constant 0 : index
    %6 = vector.load %arg1[%c0_6, %c0_7, %c0_8] : memref<3x256x256xf32, #tpu.memory_space<vmem>>, vector<1x256x256xf32>
    %7 = vector.shape_cast %6 : vector<1x256x256xf32> to vector<256x256xf32>
    %cst = arith.constant dense<0.000000e+00> : vector<32x256xf32>
    %8 = tpu.matmul %1, %7, %cst {dimension_numbers = #tpu.dot_dimension_numbers<[1], [0], [0], [1], [0, 0, 1, 1], [], []>} : vector<32x256xf32>, vector<256x256xf32>, vector<32x256xf32> -> vector<32x256xf32>
    %c1_9 = arith.constant 1 : index
    %c0_10 = arith.constant 0 : index
    %c0_11 = arith.constant 0 : index
    %9 = vector.load %arg1[%c1_9, %c0_10, %c0_11] : memref<3x256x256xf32, #tpu.memory_space<vmem>>, vector<1x256x256xf32>
    %10 = vector.shape_cast %9 : vector<1x256x256xf32> to vector<256x256xf32>
    %cst_12 = arith.constant dense<0.000000e+00> : vector<32x256xf32>
    %11 = tpu.matmul %3, %10, %cst_12 {dimension_numbers = #tpu.dot_dimension_numbers<[1], [0], [0], [1], [0, 0, 1, 1], [], []>} : vector<32x256xf32>, vector<256x256xf32>, vector<32x256xf32> -> vector<32x256xf32>
    %12 = arith.addf %8, %11 : vector<32x256xf32>
    %c2_13 = arith.constant 2 : index
    %c0_14 = arith.constant 0 : index
    %c0_15 = arith.constant 0 : index
    %13 = vector.load %arg1[%c2_13, %c0_14, %c0_15] : memref<3x256x256xf32, #tpu.memory_space<vmem>>, vector<1x256x256xf32>
    %14 = vector.shape_cast %13 : vector<1x256x256xf32> to vector<256x256xf32>
    %cst_16 = arith.constant dense<0.000000e+00> : vector<32x256xf32>
    %15 = tpu.matmul %5, %14, %cst_16 {dimension_numbers = #tpu.dot_dimension_numbers<[1], [0], [0], [1], [0, 0, 1, 1], [], []>} : vector<32x256xf32>, vector<256x256xf32>, vector<32x256xf32> -> vector<32x256xf32>
    %16 = arith.addf %12, %15 : vector<32x256xf32>
    %cst_17 = arith.constant dense<0.000000e+00> : vector<256xf32>
    %17 = vector.multi_reduction <add>, %16, %cst_17 [0] : vector<32x256xf32> to vector<256xf32>
    %18 = vector.shape_cast %17 : vector<256xf32> to vector<1x256xf32>
    %c0_18 = arith.constant 0 : index
    %c0_19 = arith.constant 0 : index
    %19 = vector.load %arg9[%c0_18, %c0_19] : memref<256x16xf32, #tpu.memory_space<vmem>>, vector<256x16xf32>
    %cst_20 = arith.constant dense<0.000000e+00> : vector<1x16xf32>
    %20 = tpu.matmul %18, %19, %cst_20 {dimension_numbers = #tpu.dot_dimension_numbers<[1], [0], [0], [1], [0, 0, 1, 1], [], []>} : vector<1x256xf32>, vector<256x16xf32>, vector<1x16xf32> -> vector<1x16xf32>
    %cst_21 = arith.constant 0.001953125 : f32
    %21 = vector.broadcast %cst_21 : f32 to vector<1x16xf32>
    %22 = arith.mulf %20, %21 : vector<1x16xf32>
    %c0_22 = arith.constant 0 : index
    %c0_23 = arith.constant 0 : index
    %23 = vector.load %arg10[%c0_22, %c0_23] : memref<16x256xf32, #tpu.memory_space<vmem>>, vector<16x256xf32>
    %cst_24 = arith.constant dense<0.000000e+00> : vector<1x256xf32>
    %24 = tpu.matmul %22, %23, %cst_24 {dimension_numbers = #tpu.dot_dimension_numbers<[1], [0], [0], [1], [0, 0, 1, 1], [], []>} : vector<1x16xf32>, vector<16x256xf32>, vector<1x256xf32> -> vector<1x256xf32>
    %25 = vector.broadcast %24 : vector<1x256xf32> to vector<32x256xf32>
    %26 = arith.subf %16, %25 : vector<32x256xf32>
    %27 = arith.mulf %26, %26 : vector<32x256xf32>
    %cst_25 = arith.constant dense<0.000000e+00> : vector<256xf32>
    %28 = vector.multi_reduction <add>, %27, %cst_25 [0] : vector<32x256xf32> to vector<256xf32>
    %29 = vector.shape_cast %28 : vector<256xf32> to vector<1x256xf32>
    %c0_26 = arith.constant 0 : index
    %c0_27 = arith.constant 0 : index
    %30 = vector.load %arg9[%c0_26, %c0_27] : memref<256x16xf32, #tpu.memory_space<vmem>>, vector<256x16xf32>
    %cst_28 = arith.constant dense<0.000000e+00> : vector<1x16xf32>
    %31 = tpu.matmul %29, %30, %cst_28 {dimension_numbers = #tpu.dot_dimension_numbers<[1], [0], [0], [1], [0, 0, 1, 1], [], []>} : vector<1x256xf32>, vector<256x16xf32>, vector<1x16xf32> -> vector<1x16xf32>
    %cst_29 = arith.constant 0.001953125 : f32
    %32 = vector.broadcast %cst_29 : f32 to vector<1x16xf32>
    %33 = arith.mulf %31, %32 : vector<1x16xf32>
    %cst_30 = arith.constant 9.99999974E-6 : f32
    %34 = vector.broadcast %cst_30 : f32 to vector<1x16xf32>
    %35 = arith.addf %33, %34 : vector<1x16xf32>
    %36 = math.rsqrt %35 : vector<1x16xf32>
    %c0_31 = arith.constant 0 : index
    %c0_32 = arith.constant 0 : index
    %37 = vector.load %arg10[%c0_31, %c0_32] : memref<16x256xf32, #tpu.memory_space<vmem>>, vector<16x256xf32>
    %cst_33 = arith.constant dense<0.000000e+00> : vector<1x256xf32>
    %38 = tpu.matmul %36, %37, %cst_33 {dimension_numbers = #tpu.dot_dimension_numbers<[1], [0], [0], [1], [0, 0, 1, 1], [], []>} : vector<1x16xf32>, vector<16x256xf32>, vector<1x256xf32> -> vector<1x256xf32>
    %39 = vector.broadcast %38 : vector<1x256xf32> to vector<32x256xf32>
    %40 = arith.mulf %26, %39 : vector<32x256xf32>
    %c0_34 = arith.constant 0 : index
    %c0_35 = arith.constant 0 : index
    %41 = vector.load %arg2[%c0_34, %c0_35] : memref<1x256xf32, #tpu.memory_space<vmem>>, vector<1x256xf32>
    %42 = vector.broadcast %41 : vector<1x256xf32> to vector<32x256xf32>
    %43 = arith.mulf %40, %42 : vector<32x256xf32>
    %c0_36 = arith.constant 0 : index
    %c0_37 = arith.constant 0 : index
    %44 = vector.load %arg3[%c0_36, %c0_37] : memref<1x256xf32, #tpu.memory_space<vmem>>, vector<1x256xf32>
    %45 = vector.broadcast %44 : vector<1x256xf32> to vector<32x256xf32>
    %46 = arith.addf %43, %45 : vector<32x256xf32>
    %c0_38 = arith.constant 0 : index
    %c0_39 = arith.constant 0 : index
    %47 = vector.load %arg4[%c0_38, %c0_39] : memref<1x256xf32, #tpu.memory_space<vmem>>, vector<1x256xf32>
    %48 = vector.broadcast %47 : vector<1x256xf32> to vector<32x256xf32>
    %49 = arith.addf %46, %48 : vector<32x256xf32>
    %cst_40 = arith.constant 0.000000e+00 : f32
    %50 = vector.broadcast %cst_40 : f32 to vector<32x256xf32>
    %51 = arith.maximumf %49, %50 : vector<32x256xf32>
    %cst_41 = arith.constant 0.000000e+00 : f32
    %52 = vector.broadcast %cst_41 : f32 to vector<2x1x256xf32>
    %c0_42 = arith.constant 0 : index
    %c0_43 = arith.constant 0 : index
    %c0_44 = arith.constant 0 : index
    %53 = vector.load %arg12[%c0_42, %c0_43, %c0_44] : memref<2x18x256xf32, #tpu.memory_space<vmem>>, vector<2x1x256xf32>
    tpu.vector_store %arg12[%c0_42, %c0_43, %c0_44], %52 {strides = array<i32>} : memref<2x18x256xf32, #tpu.memory_space<vmem>>, vector<2x1x256xf32>,
    %c0_45 = arith.constant 0 : index
    %c17 = arith.constant 17 : index
    %c0_46 = arith.constant 0 : index
    %54 = vector.load %arg12[%c0_45, %c17, %c0_46] : memref<2x18x256xf32, #tpu.memory_space<vmem>>, vector<2x1x256xf32>
    tpu.vector_store %arg12[%c0_45, %c17, %c0_46], %52 {strides = array<i32>} : memref<2x18x256xf32, #tpu.memory_space<vmem>>, vector<2x1x256xf32>,
    %55 = vector.shape_cast %51 : vector<32x256xf32> to vector<2x16x256xf32>
    %c0_47 = arith.constant 0 : index
    %c1_48 = arith.constant 1 : index
    %c0_49 = arith.constant 0 : index
    %56 = vector.load %arg12[%c0_47, %c1_48, %c0_49] : memref<2x18x256xf32, #tpu.memory_space<vmem>>, vector<2x16x256xf32>
    tpu.vector_store %arg12[%c0_47, %c1_48, %c0_49], %55 {strides = array<i32>} : memref<2x18x256xf32, #tpu.memory_space<vmem>>, vector<2x16x256xf32>,
    %c0_50 = arith.constant 0 : index
    %c0_51 = arith.constant 0 : index
    %c0_52 = arith.constant 0 : index
    %57 = vector.load %arg12[%c0_50, %c0_51, %c0_52] : memref<2x18x256xf32, #tpu.memory_space<vmem>>, vector<2x16x256xf32>
    %58 = vector.shape_cast %57 : vector<2x16x256xf32> to vector<32x256xf32>
    %c0_53 = arith.constant 0 : index
    %c1_54 = arith.constant 1 : index
    %c0_55 = arith.constant 0 : index
    %59 = vector.load %arg12[%c0_53, %c1_54, %c0_55] : memref<2x18x256xf32, #tpu.memory_space<vmem>>, vector<2x16x256xf32>
    %60 = vector.shape_cast %59 : vector<2x16x256xf32> to vector<32x256xf32>
    %c0_56 = arith.constant 0 : index
    %c2_57 = arith.constant 2 : index
    %c0_58 = arith.constant 0 : index
    %61 = vector.load %arg12[%c0_56, %c2_57, %c0_58] : memref<2x18x256xf32, #tpu.memory_space<vmem>>, vector<2x16x256xf32>
    %62 = vector.shape_cast %61 : vector<2x16x256xf32> to vector<32x256xf32>
    %c0_59 = arith.constant 0 : index
    %c0_60 = arith.constant 0 : index
    %c0_61 = arith.constant 0 : index
    %63 = vector.load %arg5[%c0_59, %c0_60, %c0_61] : memref<3x256x256xf32, #tpu.memory_space<vmem>>, vector<1x256x256xf32>
    %64 = vector.shape_cast %63 : vector<1x256x256xf32> to vector<256x256xf32>
    %cst_62 = arith.constant dense<0.000000e+00> : vector<32x256xf32>
    %65 = tpu.matmul %58, %64, %cst_62 {dimension_numbers = #tpu.dot_dimension_numbers<[1], [0], [0], [1], [0, 0, 1, 1], [], []>} : vector<32x256xf32>, vector<256x256xf32>, vector<32x256xf32> -> vector<32x256xf32>
    %c1_63 = arith.constant 1 : index
    %c0_64 = arith.constant 0 : index
    %c0_65 = arith.constant 0 : index
    %66 = vector.load %arg5[%c1_63, %c0_64, %c0_65] : memref<3x256x256xf32, #tpu.memory_space<vmem>>, vector<1x256x256xf32>
    %67 = vector.shape_cast %66 : vector<1x256x256xf32> to vector<256x256xf32>
    %cst_66 = arith.constant dense<0.000000e+00> : vector<32x256xf32>
    %68 = tpu.matmul %60, %67, %cst_66 {dimension_numbers = #tpu.dot_dimension_numbers<[1], [0], [0], [1], [0, 0, 1, 1], [], []>} : vector<32x256xf32>, vector<256x256xf32>, vector<32x256xf32> -> vector<32x256xf32>
    %69 = arith.addf %65, %68 : vector<32x256xf32>
    %c2_67 = arith.constant 2 : index
    %c0_68 = arith.constant 0 : index
    %c0_69 = arith.constant 0 : index
    %70 = vector.load %arg5[%c2_67, %c0_68, %c0_69] : memref<3x256x256xf32, #tpu.memory_space<vmem>>, vector<1x256x256xf32>
    %71 = vector.shape_cast %70 : vector<1x256x256xf32> to vector<256x256xf32>
    %cst_70 = arith.constant dense<0.000000e+00> : vector<32x256xf32>
    %72 = tpu.matmul %62, %71, %cst_70 {dimension_numbers = #tpu.dot_dimension_numbers<[1], [0], [0], [1], [0, 0, 1, 1], [], []>} : vector<32x256xf32>, vector<256x256xf32>, vector<32x256xf32> -> vector<32x256xf32>
    %73 = arith.addf %69, %72 : vector<32x256xf32>
    %cst_71 = arith.constant dense<0.000000e+00> : vector<256xf32>
    %74 = vector.multi_reduction <add>, %73, %cst_71 [0] : vector<32x256xf32> to vector<256xf32>
    %75 = vector.shape_cast %74 : vector<256xf32> to vector<1x256xf32>
    %c0_72 = arith.constant 0 : index
    %c0_73 = arith.constant 0 : index
    %76 = vector.load %arg9[%c0_72, %c0_73] : memref<256x16xf32, #tpu.memory_space<vmem>>, vector<256x16xf32>
    %cst_74 = arith.constant dense<0.000000e+00> : vector<1x16xf32>
    %77 = tpu.matmul %75, %76, %cst_74 {dimension_numbers = #tpu.dot_dimension_numbers<[1], [0], [0], [1], [0, 0, 1, 1], [], []>} : vector<1x256xf32>, vector<256x16xf32>, vector<1x16xf32> -> vector<1x16xf32>
    %cst_75 = arith.constant 0.001953125 : f32
    %78 = vector.broadcast %cst_75 : f32 to vector<1x16xf32>
    %79 = arith.mulf %77, %78 : vector<1x16xf32>
    %c0_76 = arith.constant 0 : index
    %c0_77 = arith.constant 0 : index
    %80 = vector.load %arg10[%c0_76, %c0_77] : memref<16x256xf32, #tpu.memory_space<vmem>>, vector<16x256xf32>
    %cst_78 = arith.constant dense<0.000000e+00> : vector<1x256xf32>
    %81 = tpu.matmul %79, %80, %cst_78 {dimension_numbers = #tpu.dot_dimension_numbers<[1], [0], [0], [1], [0, 0, 1, 1], [], []>} : vector<1x16xf32>, vector<16x256xf32>, vector<1x256xf32> -> vector<1x256xf32>
    %82 = vector.broadcast %81 : vector<1x256xf32> to vector<32x256xf32>
    %83 = arith.subf %73, %82 : vector<32x256xf32>
    %84 = arith.mulf %83, %83 : vector<32x256xf32>
    %cst_79 = arith.constant dense<0.000000e+00> : vector<256xf32>
    %85 = vector.multi_reduction <add>, %84, %cst_79 [0] : vector<32x256xf32> to vector<256xf32>
    %86 = vector.shape_cast %85 : vector<256xf32> to vector<1x256xf32>
    %c0_80 = arith.constant 0 : index
    %c0_81 = arith.constant 0 : index
    %87 = vector.load %arg9[%c0_80, %c0_81] : memref<256x16xf32, #tpu.memory_space<vmem>>, vector<256x16xf32>
    %cst_82 = arith.constant dense<0.000000e+00> : vector<1x16xf32>
    %88 = tpu.matmul %86, %87, %cst_82 {dimension_numbers = #tpu.dot_dimension_numbers<[1], [0], [0], [1], [0, 0, 1, 1], [], []>} : vector<1x256xf32>, vector<256x16xf32>, vector<1x16xf32> -> vector<1x16xf32>
    %cst_83 = arith.constant 0.001953125 : f32
    %89 = vector.broadcast %cst_83 : f32 to vector<1x16xf32>
    %90 = arith.mulf %88, %89 : vector<1x16xf32>
    %cst_84 = arith.constant 9.99999974E-6 : f32
    %91 = vector.broadcast %cst_84 : f32 to vector<1x16xf32>
    %92 = arith.addf %90, %91 : vector<1x16xf32>
    %93 = math.rsqrt %92 : vector<1x16xf32>
    %c0_85 = arith.constant 0 : index
    %c0_86 = arith.constant 0 : index
    %94 = vector.load %arg10[%c0_85, %c0_86] : memref<16x256xf32, #tpu.memory_space<vmem>>, vector<16x256xf32>
    %cst_87 = arith.constant dense<0.000000e+00> : vector<1x256xf32>
    %95 = tpu.matmul %93, %94, %cst_87 {dimension_numbers = #tpu.dot_dimension_numbers<[1], [0], [0], [1], [0, 0, 1, 1], [], []>} : vector<1x16xf32>, vector<16x256xf32>, vector<1x256xf32> -> vector<1x256xf32>
    %96 = vector.broadcast %95 : vector<1x256xf32> to vector<32x256xf32>
    %97 = arith.mulf %83, %96 : vector<32x256xf32>
    %c0_88 = arith.constant 0 : index
    %c0_89 = arith.constant 0 : index
    %98 = vector.load %arg6[%c0_88, %c0_89] : memref<1x256xf32, #tpu.memory_space<vmem>>, vector<1x256xf32>
    %99 = vector.broadcast %98 : vector<1x256xf32> to vector<32x256xf32>
    %100 = arith.mulf %97, %99 : vector<32x256xf32>
    %c0_90 = arith.constant 0 : index
    %c0_91 = arith.constant 0 : index
    %101 = vector.load %arg7[%c0_90, %c0_91] : memref<1x256xf32, #tpu.memory_space<vmem>>, vector<1x256xf32>
    %102 = vector.broadcast %101 : vector<1x256xf32> to vector<32x256xf32>
    %103 = arith.addf %100, %102 : vector<32x256xf32>
    %c0_92 = arith.constant 0 : index
    %c0_93 = arith.constant 0 : index
    %104 = vector.load %arg8[%c0_92, %c0_93] : memref<1x256xf32, #tpu.memory_space<vmem>>, vector<1x256xf32>
    %105 = vector.broadcast %104 : vector<1x256xf32> to vector<32x256xf32>
    %106 = arith.addf %103, %105 : vector<32x256xf32>
    %107 = arith.addf %106, %3 : vector<32x256xf32>
    %cst_94 = arith.constant 0.000000e+00 : f32
    %108 = vector.broadcast %cst_94 : f32 to vector<32x256xf32>
    %109 = arith.maximumf %107, %108 : vector<32x256xf32>
    %c0_95 = arith.constant 0 : index
    %c0_96 = arith.constant 0 : index
    %110 = vector.load %arg11[%c0_95, %c0_96] : memref<32x256xf32, #tpu.memory_space<vmem>>, vector<32x256xf32>
    tpu.vector_store %arg11[%c0_95, %c0_96], %109 {strides = array<i32>} : memref<32x256xf32, #tpu.memory_space<vmem>>, vector<32x256xf32>,
    return
  }
}

</mosaic_0001>

<bundles_post_ra>
// kernel: tpu_custom_call.1
= control target key start
LH: loop header
LB: loop body
LE: loop exit
PB: predicated region body
PF: predicated region fallthrough
CT: control target
= control target key end

     0   :  { %16 = vsyncpa [#allocation4], 0  ;;  %s3191_s0 = inlined_call_operand.vmem [shape: f32[2,18,256], index: 0, kind: input, shape index: {}]   ;;  %s3192_s1 = inlined_call_operand.hbm [shape: f32[3,256,256], index: 1, kind: input, shape index: {}]   ;;  %s3193_s2 = inlined_call_operand.vmem [shape: f32[1,256], index: 2, kind: input, shape index: {}]   ;;  %s3194_s3 = inlined_call_operand.vmem [shape: f32[1,256], index: 3, kind: input, shape index: {}]   ;;  %s3195_s4 = inlined_call_operand.vmem [shape: f32[1,256], index: 4, kind: input, shape index: {}]   ;;  %s3196_s5 = inlined_call_operand.hbm [shape: f32[3,256,256], index: 5, kind: input, shape index: {}]   ;;  %s3197_s6 = inlined_call_operand.vmem [shape: f32[1,256], index: 6, kind: input, shape index: {}]   ;;  %s3198_s7 = inlined_call_operand.vmem [shape: f32[1,256], index: 7, kind: input, shape index: {}]   ;;  %s3199_s8 = inlined_call_operand.vmem [shape: f32[1,256], index: 8, kind: input, shape index: {}]   ;;  %s3200_s9 = inlined_call_operand.vmem [shape: f32[256,16], index: 9, kind: input, shape index: {}]   ;;  %s3201_s10 = inlined_call_operand.vmem [shape: f32[16,256], index: 10, kind: input, shape index: {}]   ;;  %s3202_s11 = inlined_call_operand.hbm [shape: f32[32,256], index: 11, kind: output, shape index: {}]  }
   0x1   :  { %17 = vsyncpa [#allocation7], 0 }
   0x2   :  { %18 = vsyncpa [#allocation5], 0  ;;  %s25_s19 = sshll.u32 %s3192_s1, 4  ;;  %s2224_s20 = smov [#allocation3]   ;;  %s26_s19 = int_to_ptr.hbm [resolvable:$true] %s25_s19 }
   0x3   :  { %s27_s21 = sshll.u32 %s2224_s20, 4  ;;  %s44_s24 = sshll.u32 %s3196_s5, 4  ;;  %s28_s21 = int_to_ptr.vmem [resolvable:$true] %s27_s21  ;;  %s45_s24 = int_to_ptr.hbm [resolvable:$true] %s44_s24 }
   0x4   :  { %s2225_s25 = smov 256   ;;  %s2226_s26 = smov 16  }
   0x5   :  { %33 = dma.hbm_to_vmem [thread:$0]  %s26_s19, 24576, %s28_s21, [#allocation4], %s2225_s25, %s2225_s25, %s2226_s26  }
   0x6   :  { %s2227_s27 = smov [#allocation6]  }
   0x7   :  { %s46_s28 = sshll.u32 %s2227_s27, 4  ;;  %s47_s28 = int_to_ptr.vmem [resolvable:$true] %s46_s28 }
   0x8   :  { %52 = dma.hbm_to_vmem [thread:$0]  %s45_s24, 24576, %s47_s28, [#allocation7], %s2225_s25, %s2225_s25, %s2226_s26  }
   0x9   :  { %2218 = dma.done.wait [#allocation4], 24576  }
   0xa   :  { %2219 = vsyncadd [#allocation4], 4294942720 }
   0xb   :  { %2220 = dma.done.wait [#allocation7], 24576  }
   0xc   :  { %2221 = vsyncadd [#allocation7], 4294942720  ;;  %v268_v0 = vld [vmem:[#allocation3 + $0x2f0] sm:$0xff]  ;;  %v269_v2 = vld [vmem:[#allocation3 + $0x2f8] sm:$0xff]  ;;  %vm99_vm0 = vcmask 1046528   ;;  %vm144_vm1 = vcmask 1045504  }
   0xd   :  { %v300_v1 = vld [vmem:[#allocation3 + $0x3f0] sm:$0xff]  ;;  %302 = vmatpush.msra.mxu0 %v268_v0  ;;  %v301_v3 = vld [vmem:[#allocation3 + $0x3f8] sm:$0xff]  ;;  %v266_v4 = vld [vmem:[#allocation3 + $0x2e0] sm:$0xff]  ;;  %360 = vmatpush.msra.mxu2 %v269_v2  ;;  %vm818_vm2 = vcmask 130048   ;;  %vm1076_vm7 = vcmask 1040384   ;;  %s2114_s20 = sshll.u32 %s3202_s11, 4  ;;  %s2115_s20 = int_to_ptr.hbm [resolvable:$true] %s2114_s20 }
   0xe   :  { %331 = vmatpush.msra.mxu1 %v300_v1  ;;  %v298_v5 = vld [vmem:[#allocation3 + $0x3e0] sm:$0xff]  ;;  %389 = vmatpush.msra.mxu3 %v301_v3  ;;  %v267_v6 = vld [vmem:[#allocation3 + $0x2e8] sm:$0xff]  ;;  %v264_v8 = vld [vmem:[#allocation3 + $0x2d0] sm:$0xff] }
   0xf   :  { %v299_v7 = vld [vmem:[#allocation3 + $0x3e8] sm:$0xff]  ;;  %303 = vmatpush.msra.mxu0 %v266_v4  ;;  %v296_v9 = vld [vmem:[#allocation3 + $0x3d0] sm:$0xff]  ;;  %v265_v10 = vld [vmem:[#allocation3 + $0x2d8] sm:$0xff]  ;;  %361 = vmatpush.msra.mxu2 %v267_v6 }
  0x10   :  { %332 = vmatpush.msra.mxu1 %v298_v5  ;;  %v297_v11 = vld [vmem:[#allocation3 + $0x3d8] sm:$0xff]  ;;  %390 = vmatpush.msra.mxu3 %v299_v7  ;;  %v262_v12 = vld [vmem:[#allocation3 + $0x2c0] sm:$0xff]  ;;  %v263_v14 = vld [vmem:[#allocation3 + $0x2c8] sm:$0xff] }
  0x11   :  { %v294_v13 = vld [vmem:[#allocation3 + $0x3c0] sm:$0xff]  ;;  %304 = vmatpush.msra.mxu0 %v264_v8  ;;  %v295_v15 = vld [vmem:[#allocation3 + $0x3c8] sm:$0xff]  ;;  %362 = vmatpush.msra.mxu2 %v265_v10  ;;  %v260_v16 = vld [vmem:[#allocation3 + $0x2b0] sm:$0xff] }
  0x12   :  { %333 = vmatpush.msra.mxu1 %v296_v9  ;;  %391 = vmatpush.msra.mxu3 %v297_v11  ;;  %v292_v17 = vld [vmem:[#allocation3 + $0x3b0] sm:$0xff]  ;;  %v261_v18 = vld [vmem:[#allocation3 + $0x2b8] sm:$0xff]  ;;  %v258_v20 = vld [vmem:[#allocation3 + $0x2a0] sm:$0xff] }
  0x13   :  { %305 = vmatpush.msra.mxu0 %v262_v12  ;;  %v293_v19 = vld [vmem:[#allocation3 + $0x3b8] sm:$0xff]  ;;  %363 = vmatpush.msra.mxu2 %v263_v14  ;;  %v290_v21 = vld [vmem:[#allocation3 + $0x3a0] sm:$0xff]  ;;  %v259_v22 = vld [vmem:[#allocation3 + $0x2a8] sm:$0xff] }
  0x14   :  { %334 = vmatpush.msra.mxu1 %v294_v13  ;;  %392 = vmatpush.msra.mxu3 %v295_v15  ;;  %v291_v23 = vld [vmem:[#allocation3 + $0x3a8] sm:$0xff]  ;;  %v256_v24 = vld [vmem:[#allocation3 + $0x290] sm:$0xff]  ;;  %v257_v26 = vld [vmem:[#allocation3 + $0x298] sm:$0xff] }
  0x15   :  { %306 = vmatpush.msra.mxu0 %v260_v16  ;;  %364 = vmatpush.msra.mxu2 %v261_v18  ;;  %v288_v25 = vld [vmem:[#allocation3 + $0x390] sm:$0xff]  ;;  %v289_v27 = vld [vmem:[#allocation3 + $0x398] sm:$0xff]  ;;  %v254_v28 = vld [vmem:[#allocation3 + $0x280] sm:$0xff] }
  0x16   :  { %335 = vmatpush.msra.mxu1 %v292_v17  ;;  %393 = vmatpush.msra.mxu3 %v293_v19  ;;  %v286_v29 = vld [vmem:[#allocation3 + $0x380] sm:$0xff]  ;;  %v255_v30 = vld [vmem:[#allocation3 + $0x288] sm:$0xff]  ;;  %v252_v32 = vld [vmem:[#allocation3 + $0x270] sm:$0xff] }
  0x17   :  { %307 = vmatpush.msra.mxu0 %v258_v20  ;;  %365 = vmatpush.msra.mxu2 %v259_v22  ;;  %v287_v31 = vld [vmem:[#allocation3 + $0x388] sm:$0xff]  ;;  %v284_v33 = vld [vmem:[#allocation3 + $0x370] sm:$0xff]  ;;  %v253_v34 = vld [vmem:[#allocation3 + $0x278] sm:$0xff] }
  0x18   :  { %336 = vmatpush.msra.mxu1 %v290_v21  ;;  %394 = vmatpush.msra.mxu3 %v291_v23  ;;  %v285_v35 = vld [vmem:[#allocation3 + $0x378] sm:$0xff]  ;;  %v250_v36 = vld [vmem:[#allocation3 + $0x260] sm:$0xff]  ;;  %v251_v38 = vld [vmem:[#allocation3 + $0x268] sm:$0xff] }
  0x19   :  { %308 = vmatpush.msra.mxu0 %v256_v24  ;;  %366 = vmatpush.msra.mxu2 %v257_v26  ;;  %v282_v37 = vld [vmem:[#allocation3 + $0x360] sm:$0xff]  ;;  %v283_v39 = vld [vmem:[#allocation3 + $0x368] sm:$0xff]  ;;  %v248_v40 = vld [vmem:[#allocation3 + $0x250] sm:$0xff] }
  0x1a   :  { %337 = vmatpush.msra.mxu1 %v288_v25  ;;  %395 = vmatpush.msra.mxu3 %v289_v27  ;;  %v280_v41 = vld [vmem:[#allocation3 + $0x350] sm:$0xff]  ;;  %v249_v42 = vld [vmem:[#allocation3 + $0x258] sm:$0xff]  ;;  %v246_v44 = vld [vmem:[#allocation3 + $0x240] sm:$0xff] }
  0x1b   :  { %309 = vmatpush.msra.mxu0 %v254_v28  ;;  %367 = vmatpush.msra.mxu2 %v255_v30  ;;  %v281_v43 = vld [vmem:[#allocation3 + $0x358] sm:$0xff]  ;;  %v278_v45 = vld [vmem:[#allocation3 + $0x340] sm:$0xff]  ;;  %v247_v46 = vld [vmem:[#allocation3 + $0x248] sm:$0xff] }
  0x1c   :  { %338 = vmatpush.msra.mxu1 %v286_v29  ;;  %396 = vmatpush.msra.mxu3 %v287_v31  ;;  %v279_v47 = vld [vmem:[#allocation3 + $0x348] sm:$0xff]  ;;  %v244_v48 = vld [vmem:[#allocation3 + $0x230] sm:$0xff]  ;;  %v245_v50 = vld [vmem:[#allocation3 + $0x238] sm:$0xff] }
  0x1d   :  { %310 = vmatpush.msra.mxu0 %v252_v32  ;;  %368 = vmatpush.msra.mxu2 %v253_v34  ;;  %v276_v49 = vld [vmem:[#allocation3 + $0x330] sm:$0xff]  ;;  %v277_v51 = vld [vmem:[#allocation3 + $0x338] sm:$0xff]  ;;  %v79_v53 = vld [vmem:[%s3191_s0] sm:$0xfe] }
  0x1e   :  { %339 = vmatpush.msra.mxu1 %v284_v33  ;;  %397 = vmatpush.msra.mxu3 %v285_v35  ;;  %v2305_v52 = vld [vmem:[%s3191_s0 + $0x10] sm:$0xff]  ;;  %v2313_v54 = vld [vmem:[%s3191_s0 + $0x18] sm:$0xff]  ;;  %v80_v55 = vld [vmem:[%s3191_s0 + $0x8] sm:$0xfe]  ;;  %v100_v62 = vrot.slane %v79_v53, 1 }
  0x1f   :  { %311 = vmatpush.msra.mxu0 %v250_v36  ;;  %369 = vmatpush.msra.mxu2 %v251_v38  ;;  %v242_v56 = vld [vmem:[#allocation3 + $0x220] sm:$0xff]  ;;  %v243_v58 = vld [vmem:[#allocation3 + $0x228] sm:$0xff]  ;;  %v240_v60 = vld [vmem:[#allocation3 + $0x210] sm:$0xff]  ;;  %v101_v63 = vrot.slane %v2305_v52, 1  ;;  %v103_v0 = vrot.slane %v80_v55, 1  ;;  %v104_v1 = vrot.slane %v2313_v54, 1 }
  0x20   :  { %340 = vmatpush.msra.mxu1 %v282_v37  ;;  %398 = vmatpush.msra.mxu3 %v283_v39  ;;  %v274_v57 = vld [vmem:[#allocation3 + $0x320] sm:$0xff]  ;;  %v275_v59 = vld [vmem:[#allocation3 + $0x328] sm:$0xff]  ;;  %v272_v61 = vld [vmem:[#allocation3 + $0x310] sm:$0xff] }
  0x21   :  { %312 = vmatpush.msra.mxu0 %v248_v40  ;;  %370 = vmatpush.msra.mxu2 %v249_v42  ;;  %v241_v2 = vld [vmem:[#allocation3 + $0x218] sm:$0xff]  ;;  %v238_v4 = vld [vmem:[#allocation3 + $0x200] sm:$0xff]  ;;  %v239_v6 = vld [vmem:[#allocation3 + $0x208] sm:$0xff]  ;;  %v2321_v8 = vsel %vm99_vm0, %v100_v62, %v101_v63  ;;  %v2324_v9 = vsel %vm99_vm0, %v103_v0, %v104_v1 }
  0x22   :  { %341 = vmatpush.msra.mxu1 %v280_v41  ;;  %399 = vmatpush.msra.mxu3 %v281_v43  ;;  %v273_v3 = vld [vmem:[#allocation3 + $0x318] sm:$0xff]  ;;  %v270_v5 = vld [vmem:[#allocation3 + $0x300] sm:$0xff]  ;;  %v271_v7 = vld [vmem:[#allocation3 + $0x308] sm:$0xff]  ;;  %3223 = vst [vmem:[#allocation12_spill] sm:$0xff] %v2321_v8 }
  0x23   :  { %313 = vmatpush.msra.mxu0 %v246_v44  ;;  %371 = vmatpush.msra.mxu2 %v247_v46  ;;  %3224 = vst [vmem:[#allocation13_spill] sm:$0xff] %v2324_v9  ;;  %v204_v10 = vld [vmem:[#allocation3 + $0xf8] sm:$0xff]  ;;  %v203_v12 = vld [vmem:[#allocation3 + $0xf0] sm:$0xff]  ;;  %v81_v14 = vld [vmem:[%s3191_s0 + $0x20] sm:$0x1] }
  0x24   :  { %342 = vmatpush.msra.mxu1 %v278_v45  ;;  %400 = vmatpush.msra.mxu3 %v279_v47  ;;  %v236_v11 = vld [vmem:[#allocation3 + $0x1f8] sm:$0xff]  ;;  %v235_v13 = vld [vmem:[#allocation3 + $0x1f0] sm:$0xff]  ;;  %v82_v15 = vld [vmem:[%s3191_s0 + $0x28] sm:$0x1]  ;;  %v106_v22 = vrot.slane %v81_v14, 1 }
  0x25   :  { %314 = vmatpush.msra.mxu0 %v244_v48  ;;  %372 = vmatpush.msra.mxu2 %v245_v50  ;;  %v202_v16 = vld [vmem:[#allocation3 + $0xe8] sm:$0xff]  ;;  %v201_v18 = vld [vmem:[#allocation3 + $0xe0] sm:$0xff]  ;;  %v200_v20 = vld [vmem:[#allocation3 + $0xd8] sm:$0xff]  ;;  %v108_v23 = vrot.slane %v82_v15, 1 }
  0x26   :  { %343 = vmatpush.msra.mxu1 %v276_v49  ;;  %401 = vmatpush.msra.mxu3 %v277_v51  ;;  %v234_v17 = vld [vmem:[#allocation3 + $0x1e8] sm:$0xff]  ;;  %v233_v19 = vld [vmem:[#allocation3 + $0x1e0] sm:$0xff]  ;;  %v232_v21 = vld [vmem:[#allocation3 + $0x1d8] sm:$0xff]  ;;  %v2337_v30 = vsel %vm99_vm0, %v101_v63, %v106_v22 }
  0x27   :  { %315 = vmatpush.msra.mxu0 %v242_v56  ;;  %373 = vmatpush.msra.mxu2 %v243_v58  ;;  %v199_v24 = vld [vmem:[#allocation3 + $0xd0] sm:$0xff]  ;;  %v198_v26 = vld [vmem:[#allocation3 + $0xc8] sm:$0xff]  ;;  %v197_v28 = vld [vmem:[#allocation3 + $0xc0] sm:$0xff]  ;;  %3225 = vst [vmem:[#allocation14_spill] sm:$0xff] %v2337_v30  ;;  %v2340_v31 = vsel %vm99_vm0, %v104_v1, %v108_v23 }
  0x28   :  { %344 = vmatpush.msra.mxu1 %v274_v57  ;;  %402 = vmatpush.msra.mxu3 %v275_v59  ;;  %v231_v25 = vld [vmem:[#allocation3 + $0x1d0] sm:$0xff]  ;;  %v230_v27 = vld [vmem:[#allocation3 + $0x1c8] sm:$0xff]  ;;  %v229_v29 = vld [vmem:[#allocation3 + $0x1c0] sm:$0xff]  ;;  %3226 = vst [vmem:[#allocation15_spill] sm:$0xff] %v2340_v31 }
  0x29   :  { %316 = vmatpush.msra.mxu0 %v240_v60  ;;  %374 = vmatpush.msra.mxu2 %v241_v2  ;;  %v196_v32 = vld [vmem:[#allocation3 + $0xb8] sm:$0xff]  ;;  %v195_v34 = vld [vmem:[#allocation3 + $0xb0] sm:$0xff]  ;;  %v2345_v36 = vld [vmem:[%s3191_s0 + $0x40] sm:$0xff] }
  0x2a   :  { %345 = vmatpush.msra.mxu1 %v272_v61  ;;  %403 = vmatpush.msra.mxu3 %v273_v3  ;;  %v228_v33 = vld [vmem:[#allocation3 + $0x1b8] sm:$0xff]  ;;  %v227_v35 = vld [vmem:[#allocation3 + $0x1b0] sm:$0xff]  ;;  %v2355_v38 = vld [vmem:[%s3191_s0 + $0x48] sm:$0xff]  ;;  %v111_v47 = vrot.slane %v2345_v36, 1 }
  0x2b   :  { %317 = vmatpush.msra.mxu0 %v238_v4  ;;  %375 = vmatpush.msra.mxu2 %v239_v6  ;;  %v83_v37 = vld [vmem:[%s3191_s0 + $0x30] sm:$0xfe]  ;;  %v84_v39 = vld [vmem:[%s3191_s0 + $0x38] sm:$0xfe]  ;;  %v194_v40 = vld [vmem:[#allocation3 + $0xa8] sm:$0xff]  ;;  %v114_v49 = vrot.slane %v2355_v38, 1 }
  0x2c   :  { %346 = vmatpush.msra.mxu1 %v270_v5  ;;  %404 = vmatpush.msra.mxu3 %v271_v7  ;;  %v226_v41 = vld [vmem:[#allocation3 + $0x1a8] sm:$0xff]  ;;  %v193_v42 = vld [vmem:[#allocation3 + $0xa0] sm:$0xff]  ;;  %v192_v44 = vld [vmem:[#allocation3 + $0x98] sm:$0xff]  ;;  %v110_v46 = vrot.slane %v83_v37, 1  ;;  %v113_v48 = vrot.slane %v84_v39, 1 }
  0x2d   :  { %318 = vmatmul.f32.vlgmr.msra.gmra.mxu0 %v2321_v8  ;;  %347 = vmatmul.f32.vlgmr.msra.gmra.mxu1 %v2324_v9  ;;  %v225_v43 = vld [vmem:[#allocation3 + $0x1a0] sm:$0xff]  ;;  %v224_v45 = vld [vmem:[#allocation3 + $0x198] sm:$0xff]  ;;  %v191_v50 = vld [vmem:[#allocation3 + $0x90] sm:$0xff] }
  0x2e   :  { %376 = vmatmul.f32.vlgmr.msra.gmra.mxu2 %v2321_v8  ;;  %405 = vmatmul.f32.vlgmr.msra.gmra.mxu3 %v2324_v9  ;;  %v223_v51 = vld [vmem:[#allocation3 + $0x190] sm:$0xff]  ;;  %v190_v53 = vld [vmem:[#allocation3 + $0x88] sm:$0xff]  ;;  %v189_v56 = vld [vmem:[#allocation3 + $0x80] sm:$0xff]  ;;  %v2365_v58 = vsel %vm99_vm0, %v110_v46, %v111_v47  ;;  %v2368_v59 = vsel %vm99_vm0, %v113_v48, %v114_v49 }
  0x2f   :  { %476 = vmatpush.msrb.mxu2 %v204_v10  ;;  %505 = vmatpush.msrb.mxu3 %v236_v11  ;;  %v222_v55 = vld [vmem:[#allocation3 + $0x188] sm:$0xff]  ;;  %v221_v57 = vld [vmem:[#allocation3 + $0x180] sm:$0xff]  ;;  %3227 = vst [vmem:[#allocation16_spill] sm:$0xff] %v2365_v58  ;;  %v188_v60 = vld [vmem:[#allocation3 + $0x78] sm:$0xff] }
  0x30   :  { %418 = vmatpush.msrb.mxu0 %v203_v12  ;;  %447 = vmatpush.msrb.mxu1 %v235_v13  ;;  %3228 = vst [vmem:[#allocation17_spill] sm:$0xff] %v2368_v59  ;;  %v220_v61 = vld [vmem:[#allocation3 + $0x178] sm:$0xff]  ;;  %v187_v62 = vld [vmem:[#allocation3 + $0x70] sm:$0xff]  ;;  %v186_v2 = vld [vmem:[#allocation3 + $0x68] sm:$0xff] }
  0x31   :  { %477 = vmatpush.msrb.mxu2 %v202_v16  ;;  %506 = vmatpush.msrb.mxu3 %v234_v17  ;;  %v219_v63 = vld [vmem:[#allocation3 + $0x170] sm:$0xff]  ;;  %v86_v1 = vld [vmem:[%s3191_s0 + $0x58] sm:$0x1]  ;;  %v218_v3 = vld [vmem:[#allocation3 + $0x168] sm:$0xff] }
  0x32   :  { %419 = vmatpush.msrb.mxu0 %v201_v18  ;;  %448 = vmatpush.msrb.mxu1 %v233_v19  ;;  %v85_v0 = vld [vmem:[%s3191_s0 + $0x50] sm:$0x1]  ;;  %v185_v4 = vld [vmem:[#allocation3 + $0x60] sm:$0xff]  ;;  %v184_v6 = vld [vmem:[#allocation3 + $0x58] sm:$0xff]  ;;  %v118_v11 = vrot.slane %v86_v1, 1 }
  0x33   :  { %478 = vmatpush.msrb.mxu2 %v200_v20  ;;  %507 = vmatpush.msrb.mxu3 %v232_v21  ;;  %v217_v5 = vld [vmem:[#allocation3 + $0x160] sm:$0xff]  ;;  %v216_v7 = vld [vmem:[#allocation3 + $0x158] sm:$0xff]  ;;  %v116_v10 = vrot.slane %v85_v0, 1  ;;  %v183_v12 = vld [vmem:[#allocation3 + $0x50] sm:$0xff] }
  0x34   :  { %420 = vmatpush.msrb.mxu0 %v199_v24  ;;  %449 = vmatpush.msrb.mxu1 %v231_v25  ;;  %v215_v13 = vld [vmem:[#allocation3 + $0x150] sm:$0xff]  ;;  %v182_v14 = vld [vmem:[#allocation3 + $0x48] sm:$0xff]  ;;  %v181_v16 = vld [vmem:[#allocation3 + $0x40] sm:$0xff]  ;;  %v2384_v19 = vsel %vm99_vm0, %v114_v49, %v118_v11 }
  0x35   :  { %479 = vmatpush.msrb.mxu2 %v198_v26  ;;  %508 = vmatpush.msrb.mxu3 %v230_v27  ;;  %v214_v15 = vld [vmem:[#allocation3 + $0x148] sm:$0xff]  ;;  %v213_v17 = vld [vmem:[#allocation3 + $0x140] sm:$0xff]  ;;  %v2381_v18 = vsel %vm99_vm0, %v111_v47, %v116_v10  ;;  %3230 = vst [vmem:[#allocation19_spill] sm:$0xff] %v2384_v19  ;;  %v180_v20 = vld [vmem:[#allocation3 + $0x38] sm:$0xff] }
  0x36   :  { %421 = vmatpush.msrb.mxu0 %v197_v28  ;;  %450 = vmatpush.msrb.mxu1 %v229_v29  ;;  %3229 = vst [vmem:[#allocation18_spill] sm:$0xff] %v2381_v18  ;;  %v212_v21 = vld [vmem:[#allocation3 + $0x138] sm:$0xff]  ;;  %v179_v22 = vld [vmem:[#allocation3 + $0x30] sm:$0xff]  ;;  %v178_v24 = vld [vmem:[#allocation3 + $0x28] sm:$0xff] }
  0x37   :  { %321 = vmatmul.f32.gmra.mxu0 %v2337_v30  ;;  %350 = vmatmul.f32.gmra.mxu1 %v2340_v31  ;;  %v211_v23 = vld [vmem:[#allocation3 + $0x130] sm:$0xff]  ;;  %v210_v25 = vld [vmem:[#allocation3 + $0x128] sm:$0xff]  ;;  %v177_v26 = vld [vmem:[#allocation3 + $0x20] sm:$0xff] }
  0x38   :  { %379 = vmatmul.f32.gmra.mxu2 %v2337_v30  ;;  %408 = vmatmul.f32.gmra.mxu3 %v2340_v31  ;;  %v209_v27 = vld [vmem:[#allocation3 + $0x120] sm:$0xff]  ;;  %v176_v28 = vld [vmem:[#allocation3 + $0x18] sm:$0xff]  ;;  %v564_v46 = vld [vmem:[#allocation3 + $0x4e8] sm:$0xff] }
  0x39   :  { %480 = vmatpush.msrb.mxu2 %v196_v32  ;;  %509 = vmatpush.msrb.mxu3 %v228_v33  ;;  %v208_v29 = vld [vmem:[#allocation3 + $0x118] sm:$0xff]  ;;  %v175_v32 = vld [vmem:[#allocation3 + $0x10] sm:$0xff]  ;;  %v173_v37 = vld [vmem:[#allocation3] sm:$0xff] }
  0x3a   :  { %422 = vmatpush.msrb.mxu0 %v195_v34  ;;  %451 = vmatpush.msrb.mxu1 %v227_v35  ;;  %v207_v33 = vld [vmem:[#allocation3 + $0x110] sm:$0xff]  ;;  %v174_v34 = vld [vmem:[#allocation3 + $0x8] sm:$0xff]  ;;  %v205_v39 = vld [vmem:[#allocation3 + $0x100] sm:$0xff] }
  0x3b   :  { %481 = vmatpush.msrb.mxu2 %v194_v40  ;;  %510 = vmatpush.msrb.mxu3 %v226_v41  ;;  %v206_v35 = vld [vmem:[#allocation3 + $0x108] sm:$0xff]  ;;  %v71_v40 = vld [vmem:[%s3191_s0] sm:$0xff]  ;;  %v557_v0 = vld [vmem:[#allocation3 + $0x4b0] sm:$0xff] }
  0x3c   :  { %423 = vmatpush.msrb.mxu0 %v193_v42  ;;  %452 = vmatpush.msrb.mxu1 %v225_v43  ;;  %v72_v41 = vld [vmem:[%s3191_s0 + $0x8] sm:$0xff]  ;;  %v566_v42 = vld [vmem:[#allocation3 + $0x4f8] sm:$0xff]  ;;  %v563_v48 = vld [vmem:[#allocation3 + $0x4e0] sm:$0xff] }
  0x3d   :  { %482 = vmatpush.msrb.mxu2 %v192_v44  ;;  %511 = vmatpush.msrb.mxu3 %v224_v45  ;;  %v598_v43 = vld [vmem:[#allocation3 + $0x5f8] sm:$0xff]  ;;  %v565_v44 = vld [vmem:[#allocation3 + $0x4f0] sm:$0xff]  ;;  %v596_v47 = vld [vmem:[#allocation3 + $0x5e8] sm:$0xff] }
  0x3e   :  { %424 = vmatpush.msrb.mxu0 %v191_v50  ;;  %453 = vmatpush.msrb.mxu1 %v223_v51  ;;  %v597_v45 = vld [vmem:[#allocation3 + $0x5f0] sm:$0xff]  ;;  %v595_v49 = vld [vmem:[#allocation3 + $0x5e0] sm:$0xff]  ;;  %v562_v50 = vld [vmem:[#allocation3 + $0x4d8] sm:$0xff] }
  0x3f   :  { %483 = vmatpush.msrb.mxu2 %v190_v53  ;;  %512 = vmatpush.msrb.mxu3 %v222_v55  ;;  %v594_v51 = vld [vmem:[#allocation3 + $0x5d8] sm:$0xff]  ;;  %v561_v53 = vld [vmem:[#allocation3 + $0x4d0] sm:$0xff]  ;;  %v2667_v8 = vld [vmem:[%s3200_s9 + $0xa0] sm:$0xff] }
  0x40   :  { %425 = vmatpush.msrb.mxu0 %v189_v56  ;;  %454 = vmatpush.msrb.mxu1 %v221_v57  ;;  %v593_v55 = vld [vmem:[#allocation3 + $0x5d0] sm:$0xff]  ;;  %v560_v56 = vld [vmem:[#allocation3 + $0x4c8] sm:$0xff]  ;;  %3238 = vst [vmem:[#allocation27_spill] sm:$0xff] %v2667_v8 }
  0x41   :  { %324 = vmatmul.f32.gmra.mxu0 %v2365_v58  ;;  %353 = vmatmul.f32.gmra.mxu1 %v2368_v59  ;;  %v592_v57 = vld [vmem:[#allocation3 + $0x5c8] sm:$0xff]  ;;  %v589_v1 = vld [vmem:[#allocation3 + $0x5b0] sm:$0xff] }
  0x42   :  { %382 = vmatmul.f32.gmra.mxu2 %v2365_v58  ;;  %411 = vmatmul.f32.gmra.mxu3 %v2368_v59  ;;  %v553_v10 = vld [vmem:[#allocation3 + $0x490] sm:$0xff]  ;;  %v2651_v59 = vld [vmem:[%s3200_s9 + $0xa8] sm:$0xff] }
  0x43   :  { %484 = vmatpush.msrb.mxu2 %v188_v60  ;;  %513 = vmatpush.msrb.mxu3 %v220_v61  ;;  %v559_v60 = vld [vmem:[#allocation3 + $0x4c0] sm:$0xff]  ;;  %v585_v11 = vld [vmem:[#allocation3 + $0x590] sm:$0xff]  ;;  %3236 = vst [vmem:[#allocation25_spill] sm:$0xff] %v2651_v59 }
  0x44   :  { %426 = vmatpush.msrb.mxu0 %v187_v62  ;;  %455 = vmatpush.msrb.mxu1 %v219_v63  ;;  %v591_v61 = vld [vmem:[#allocation3 + $0x5c0] sm:$0xff]  ;;  %v558_v62 = vld [vmem:[#allocation3 + $0x4b8] sm:$0xff]  ;;  %v2656_v31 = vld [vmem:[%s3200_s9 + $0x10] sm:$0xff] }
  0x45   :  { %485 = vmatpush.msrb.mxu2 %v186_v2  ;;  %514 = vmatpush.msrb.mxu3 %v218_v3  ;;  %v590_v63 = vld [vmem:[#allocation3 + $0x5b8] sm:$0xff]  ;;  %v556_v2 = vld [vmem:[#allocation3 + $0x4a8] sm:$0xff]  ;;  %3237 = vst [vmem:[#allocation26_spill] sm:$0xff] %v2656_v31 }
  0x46   :  { %427 = vmatpush.msrb.mxu0 %v185_v4  ;;  %456 = vmatpush.msrb.mxu1 %v217_v5  ;;  %v588_v3 = vld [vmem:[#allocation3 + $0x5a8] sm:$0xff]  ;;  %v555_v4 = vld [vmem:[#allocation3 + $0x4a0] sm:$0xff] }
  0x47   :  { %486 = vmatpush.msrb.mxu2 %v184_v6  ;;  %515 = vmatpush.msrb.mxu3 %v216_v7  ;;  %v587_v5 = vld [vmem:[#allocation3 + $0x5a0] sm:$0xff]  ;;  %v554_v6 = vld [vmem:[#allocation3 + $0x498] sm:$0xff] }
  0x48   :  { %428 = vmatpush.msrb.mxu0 %v183_v12  ;;  %457 = vmatpush.msrb.mxu1 %v215_v13  ;;  %v586_v7 = vld [vmem:[#allocation3 + $0x598] sm:$0xff]  ;;  %v552_v12 = vld [vmem:[#allocation3 + $0x488] sm:$0xff] }
  0x49   :  { %487 = vmatpush.msrb.mxu2 %v182_v14  ;;  %516 = vmatpush.msrb.mxu3 %v214_v15  ;;  %v584_v13 = vld [vmem:[#allocation3 + $0x588] sm:$0xff]  ;;  %v551_v14 = vld [vmem:[#allocation3 + $0x480] sm:$0xff] }
  0x4a   :  { %429 = vmatpush.msrb.mxu0 %v181_v16  ;;  %458 = vmatpush.msrb.mxu1 %v213_v17  ;;  %v583_v15 = vld [vmem:[#allocation3 + $0x580] sm:$0xff]  ;;  %v75_v16 = vld [vmem:[%s3191_s0 + $0x30] sm:$0xff]  ;;  %v76_v17 = vld [vmem:[%s3191_s0 + $0x38] sm:$0xff] }
  0x4b   :  { %327 = vmatmul.f32.gmra.mxu0 %v2381_v18  ;;  %356 = vmatmul.f32.gmra.mxu1 %v2384_v19 }
  0x4c   :  { %385 = vmatmul.f32.gmra.mxu2 %v2381_v18  ;;  %414 = vmatmul.f32.gmra.mxu3 %v2384_v19  ;;  %v2644_v19 = vld [vmem:[%s3200_s9 + $0x18] sm:$0xff] }
  0x4d   :  { %488 = vmatpush.msrb.mxu2 %v180_v20  ;;  %517 = vmatpush.msrb.mxu3 %v212_v21  ;;  %v550_v20 = vld [vmem:[#allocation3 + $0x478] sm:$0xff]  ;;  %3235 = vst [vmem:[#allocation24_spill] sm:$0xff] %v2644_v19 }
  0x4e   :  { %430 = vmatpush.msrb.mxu0 %v179_v22  ;;  %459 = vmatpush.msrb.mxu1 %v211_v23  ;;  %v582_v21 = vld [vmem:[#allocation3 + $0x578] sm:$0xff]  ;;  %v549_v22 = vld [vmem:[#allocation3 + $0x470] sm:$0xff] }
  0x4f   :  { %489 = vmatpush.msrb.mxu2 %v178_v24  ;;  %518 = vmatpush.msrb.mxu3 %v210_v25  ;;  %v581_v23 = vld [vmem:[#allocation3 + $0x570] sm:$0xff]  ;;  %v548_v24 = vld [vmem:[#allocation3 + $0x468] sm:$0xff] }
  0x50   :  { %431 = vmatpush.msrb.mxu0 %v177_v26  ;;  %460 = vmatpush.msrb.mxu1 %v209_v27  ;;  %v580_v25 = vld [vmem:[#allocation3 + $0x568] sm:$0xff]  ;;  %v547_v26 = vld [vmem:[#allocation3 + $0x460] sm:$0xff] }
  0x51   :  { %490 = vmatpush.msrb.mxu2 %v176_v28  ;;  %519 = vmatpush.msrb.mxu3 %v208_v29  ;;  %v579_v27 = vld [vmem:[#allocation3 + $0x560] sm:$0xff]  ;;  %v546_v28 = vld [vmem:[#allocation3 + $0x458] sm:$0xff] }
  0x52   :  { %432 = vmatpush.msrb.mxu0 %v175_v32  ;;  %461 = vmatpush.msrb.mxu1 %v207_v33  ;;  %v578_v29 = vld [vmem:[#allocation3 + $0x558] sm:$0xff]  ;;  %v545_v32 = vld [vmem:[#allocation3 + $0x450] sm:$0xff] }
  0x53   :  { %491 = vmatpush.msrb.mxu2 %v174_v34  ;;  %520 = vmatpush.msrb.mxu3 %v206_v35  ;;  %v577_v33 = vld [vmem:[#allocation3 + $0x550] sm:$0xff]  ;;  %v544_v34 = vld [vmem:[#allocation3 + $0x448] sm:$0xff] }
  0x54   :  { %433 = vmatpush.msrb.mxu0 %v173_v37  ;;  %462 = vmatpush.msrb.mxu1 %v205_v39  ;;  %v576_v35 = vld [vmem:[#allocation3 + $0x548] sm:$0xff]  ;;  %v543_v37 = vld [vmem:[#allocation3 + $0x440] sm:$0xff] }
  0x55   :  { %434 = vmatmul.f32.vlgmr.msrb.gmra.mxu0 %v71_v40  ;;  %463 = vmatmul.f32.vlgmr.msrb.gmra.mxu1 %v72_v41  ;;  %v575_v39 = vld [vmem:[#allocation3 + $0x540] sm:$0xff] }
  0x56   :  { %492 = vmatmul.f32.vlgmr.msrb.gmra.mxu2 %v71_v40  ;;  %521 = vmatmul.f32.vlgmr.msrb.gmra.mxu3 %v72_v41  ;;  %v542_v40 = vld [vmem:[#allocation3 + $0x438] sm:$0xff] }
  0x57   :  { %657 = vmatpush.msra.mxu2 %v566_v42  ;;  %686 = vmatpush.msra.mxu3 %v598_v43  ;;  %v574_v41 = vld [vmem:[#allocation3 + $0x538] sm:$0xff]  ;;  %v541_v42 = vld [vmem:[#allocation3 + $0x430] sm:$0xff] }
  0x58   :  { %599 = vmatpush.msra.mxu0 %v565_v44  ;;  %628 = vmatpush.msra.mxu1 %v597_v45  ;;  %v573_v43 = vld [vmem:[#allocation3 + $0x530] sm:$0xff]  ;;  %v128_v44 = vld [vmem:[%s3191_s0] sm:$0xfc]  ;;  %v129_v45 = vld [vmem:[%s3191_s0 + $0x8] sm:$0xfc] }
  0x59   :  { %658 = vmatpush.msra.mxu2 %v564_v46  ;;  %687 = vmatpush.msra.mxu3 %v596_v47  ;;  %v540_v46 = vld [vmem:[#allocation3 + $0x428] sm:$0xff] }
  0x5a   :  { %600 = vmatpush.msra.mxu0 %v563_v48  ;;  %629 = vmatpush.msra.mxu1 %v595_v49  ;;  %v572_v47 = vld [vmem:[#allocation3 + $0x528] sm:$0xff]  ;;  %v539_v48 = vld [vmem:[#allocation3 + $0x420] sm:$0xff] }
  0x5b   :  { %659 = vmatpush.msra.mxu2 %v562_v50  ;;  %688 = vmatpush.msra.mxu3 %v594_v51  ;;  %v571_v49 = vld [vmem:[#allocation3 + $0x520] sm:$0xff]  ;;  %v538_v50 = vld [vmem:[#allocation3 + $0x418] sm:$0xff] }
  0x5c   :  { %601 = vmatpush.msra.mxu0 %v561_v53  ;;  %630 = vmatpush.msra.mxu1 %v593_v55  ;;  %v570_v51 = vld [vmem:[#allocation3 + $0x518] sm:$0xff]  ;;  %v145_v53 = vrot.slane %v128_v44, 2  ;;  %v146_v55 = vrot.slane %v2305_v52, 2 }
  0x5d   :  { %660 = vmatpush.msra.mxu2 %v560_v56  ;;  %689 = vmatpush.msra.mxu3 %v592_v57  ;;  %v148_v56 = vrot.slane %v129_v45, 2  ;;  %v149_v57 = vrot.slane %v2313_v54, 2 }
  0x5e   :  { %602 = vmatpush.msra.mxu0 %v559_v60  ;;  %631 = vmatpush.msra.mxu1 %v591_v61  ;;  %v537_v60 = vld [vmem:[#allocation3 + $0x410] sm:$0xff] }
  0x5f   :  { %437 = vmatmul.f32.gmra.mxu0 %v2305_v52  ;;  %466 = vmatmul.f32.gmra.mxu1 %v2313_v54  ;;  %v569_v61 = vld [vmem:[#allocation3 + $0x510] sm:$0xff] }
  0x60   :  { %495 = vmatmul.f32.gmra.mxu2 %v2305_v52  ;;  %524 = vmatmul.f32.gmra.mxu3 %v2313_v54  ;;  %v147_v52 = vsel %vm144_vm1, %v145_v53, %v146_v55  ;;  %v130_v54 = vld [vmem:[%s3191_s0 + $0x20] sm:$0x3] }
  0x61   :  { %661 = vmatpush.msra.mxu2 %v558_v62  ;;  %690 = vmatpush.msra.mxu3 %v590_v63  ;;  %v536_v62 = vld [vmem:[#allocation3 + $0x408] sm:$0xff] }
  0x62   :  { %603 = vmatpush.msra.mxu0 %v557_v0  ;;  %632 = vmatpush.msra.mxu1 %v589_v1  ;;  %v568_v63 = vld [vmem:[#allocation3 + $0x508] sm:$0xff]  ;;  %v535_v0 = vld [vmem:[#allocation3 + $0x400] sm:$0xff] }
  0x63   :  { %662 = vmatpush.msra.mxu2 %v556_v2  ;;  %691 = vmatpush.msra.mxu3 %v588_v3  ;;  %v567_v1 = vld [vmem:[#allocation3 + $0x500] sm:$0xff]  ;;  %v150_v2 = vsel %vm144_vm1, %v148_v56, %v149_v57  ;;  %v131_v3 = vld [vmem:[%s3191_s0 + $0x28] sm:$0x3]  ;;  %v2501_v56 = vld [vmem:[%s3200_s9 + $0x78] sm:$0xff] }
  0x64   :  { %604 = vmatpush.msra.mxu0 %v555_v4  ;;  %633 = vmatpush.msra.mxu1 %v587_v5  ;;  %v151_v4 = vrot.slane %v130_v54, 2  ;;  %v153_v5 = vrot.slane %v131_v3, 2 }
  0x65   :  { %663 = vmatpush.msra.mxu2 %v554_v6  ;;  %692 = vmatpush.msra.mxu3 %v586_v7 }
  0x66   :  { %605 = vmatpush.msra.mxu0 %v553_v10  ;;  %634 = vmatpush.msra.mxu1 %v585_v11  ;;  %v152_v6 = vsel %vm144_vm1, %v146_v55, %v151_v4  ;;  %v154_v7 = vsel %vm144_vm1, %v149_v57, %v153_v5  ;;  %v132_v10 = vld [vmem:[%s3191_s0 + $0x30] sm:$0xfc]  ;;  %v133_v11 = vld [vmem:[%s3191_s0 + $0x38] sm:$0xfc]  ;;  %v2563_v5 = vld [vmem:[%s3200_s9 + $0xe0] sm:$0xff] }
  0x67   :  { %664 = vmatpush.msra.mxu2 %v552_v12  ;;  %693 = vmatpush.msra.mxu3 %v584_v13  ;;  %v155_v12 = vrot.slane %v132_v10, 2  ;;  %v156_v13 = vrot.slane %v2345_v36, 2  ;;  %v2507_v57 = vld [vmem:[%s3200_s9 + $0x70] sm:$0xff]  ;;  %v2580_v10 = vld [vmem:[%s3200_s9 + $0x40] sm:$0xff] }
  0x68   :  { %606 = vmatpush.msra.mxu0 %v551_v14  ;;  %635 = vmatpush.msra.mxu1 %v583_v15  ;;  %v158_v14 = vrot.slane %v133_v11, 2  ;;  %v159_v15 = vrot.slane %v2355_v38, 2  ;;  %v2556_v4 = vld [vmem:[%s3200_s9 + $0x50] sm:$0xff] }
  0x69   :  { %440 = vmatmul.f32.gmra.mxu0 %v75_v16  ;;  %469 = vmatmul.f32.gmra.mxu1 %v76_v17  ;;  %v2587_v11 = vld [vmem:[%s3200_s9 + $0xd0] sm:$0xff] }
  0x6a   :  { %498 = vmatmul.f32.gmra.mxu2 %v75_v16  ;;  %527 = vmatmul.f32.gmra.mxu3 %v76_v17  ;;  %v157_v16 = vsel %vm144_vm1, %v155_v12, %v156_v13  ;;  %v160_v17 = vsel %vm144_vm1, %v158_v14, %v159_v15  ;;  %v2592_v12 = vld [vmem:[%s3200_s9 + $0x38] sm:$0xff] }
  0x6b   :  { %665 = vmatpush.msra.mxu2 %v550_v20  ;;  %694 = vmatpush.msra.mxu3 %v582_v21  ;;  %v134_v20 = vld [vmem:[%s3191_s0 + $0x50] sm:$0x3]  ;;  %v135_v21 = vld [vmem:[%s3191_s0 + $0x58] sm:$0x3] }
  0x6c   :  { %607 = vmatpush.msra.mxu0 %v549_v22  ;;  %636 = vmatpush.msra.mxu1 %v581_v23  ;;  %v163_v22 = vrot.slane %v135_v21, 2  ;;  %v2615_v21 = vld [vmem:[%s3200_s9 + $0xc0] sm:$0xff] }
  0x6d   :  { %666 = vmatpush.msra.mxu2 %v548_v24  ;;  %695 = vmatpush.msra.mxu3 %v580_v25 }
  0x6e   :  { %608 = vmatpush.msra.mxu0 %v547_v26  ;;  %637 = vmatpush.msra.mxu1 %v579_v27  ;;  %v164_v23 = vsel %vm144_vm1, %v159_v15, %v163_v22  ;;  %v2603_v15 = vld [vmem:[%s3200_s9 + $0xc8] sm:$0xff]  ;;  %v2627_v22 = vld [vmem:[%s3200_s9 + $0xb8] sm:$0xff] }
  0x6f   :  { %667 = vmatpush.msra.mxu2 %v546_v28  ;;  %696 = vmatpush.msra.mxu3 %v578_v29  ;;  %3232 = vst [vmem:[#allocation21_spill] sm:$0xff] %v2627_v22 }
  0x70   :  { %609 = vmatpush.msra.mxu0 %v545_v32  ;;  %638 = vmatpush.msra.mxu1 %v577_v33 }
  0x71   :  { %668 = vmatpush.msra.mxu2 %v544_v34  ;;  %697 = vmatpush.msra.mxu3 %v576_v35 }
  0x72   :  { %610 = vmatpush.msra.mxu0 %v543_v37  ;;  %639 = vmatpush.msra.mxu1 %v575_v39 }
  0x73   :  { %443 = vmatmul.f32.gmra.mxu0 %v2345_v36  ;;  %472 = vmatmul.f32.gmra.mxu1 %v2355_v38 }
  0x74   :  { %501 = vmatmul.f32.gmra.mxu2 %v2345_v36  ;;  %530 = vmatmul.f32.gmra.mxu3 %v2355_v38  ;;  %v161_v36 = vrot.slane %v134_v20, 2 }
  0x75   :  { %669 = vmatpush.msra.mxu2 %v542_v40  ;;  %698 = vmatpush.msra.mxu3 %v574_v41 }
  0x76   :  { %611 = vmatpush.msra.mxu0 %v541_v42  ;;  %640 = vmatpush.msra.mxu1 %v573_v43  ;;  %v162_v38 = vsel %vm144_vm1, %v156_v13, %v161_v36  ;;  %v2620_v36 = vld [vmem:[%s3200_s9 + $0x28] sm:$0xff] }
  0x77   :  { %670 = vmatpush.msra.mxu2 %v540_v46  ;;  %699 = vmatpush.msra.mxu3 %v572_v47  ;;  %3231 = vst [vmem:[#allocation20_spill] sm:$0xff] %v2620_v36 }
  0x78   :  { %612 = vmatpush.msra.mxu0 %v539_v48  ;;  %641 = vmatpush.msra.mxu1 %v571_v49 }
  0x79   :  { %671 = vmatpush.msra.mxu2 %v538_v50  ;;  %700 = vmatpush.msra.mxu3 %v570_v51 }
  0x7a   :  { %613 = vmatpush.msra.mxu0 %v537_v60  ;;  %642 = vmatpush.msra.mxu1 %v569_v61  ;;  %v2513_v60 = vld [vmem:[%s3200_s9 + $0x68] sm:$0xff]  ;;  %v2519_v61 = vld [vmem:[%s3200_s9 + $0xf8] sm:$0xff] }
  0x7b   :  { %672 = vmatpush.msra.mxu2 %v536_v62  ;;  %701 = vmatpush.msra.mxu3 %v568_v63  ;;  %v2524_v62 = vld [vmem:[%s3200_s9 + $0x60] sm:$0xff] }
  0x7c   :  { %614 = vmatpush.msra.mxu0 %v535_v0  ;;  %643 = vmatpush.msra.mxu1 %v567_v1  ;;  %v2535_v1 = vld [vmem:[%s3200_s9 + $0xf0] sm:$0xff] }
  0x7d   :  { %615 = vmatmul.f32.vlgmr.msra.gmra.mxu0 %v147_v52  ;;  %644 = vmatmul.f32.vlgmr.msra.gmra.mxu1 %v150_v2 }
  0x7e   :  { %673 = vmatmul.f32.vlgmr.msra.gmra.mxu2 %v147_v52  ;;  %702 = vmatmul.f32.vlgmr.msra.gmra.mxu3 %v150_v2  ;;  %v2540_v52 = vld [vmem:[%s3200_s9 + $0x58] sm:$0xff]  ;;  %v2547_v2 = vld [vmem:[%s3200_s9 + $0xe8] sm:$0xff] }
  0x7f   :  { %773 = vmatpush.msrb.mxu0 %v2501_v56  ;;  %793 = vmatpush.msrb.mxu1 %v2519_v61 }
  0x81   :  { %774 = vmatpush.msrb.mxu0 %v2507_v57  ;;  %794 = vmatpush.msrb.mxu1 %v2535_v1 }
  0x83   :  { %775 = vmatpush.msrb.mxu0 %v2513_v60  ;;  %795 = vmatpush.msrb.mxu1 %v2547_v2 }
  0x85   :  { %618 = vmatmul.f32.gmra.mxu0 %v152_v6  ;;  %647 = vmatmul.f32.gmra.mxu1 %v154_v7 }
  0x86   :  { %676 = vmatmul.f32.gmra.mxu2 %v152_v6  ;;  %705 = vmatmul.f32.gmra.mxu3 %v154_v7  ;;  %v2568_v6 = vld [vmem:[%s3200_s9 + $0x48] sm:$0xff]  ;;  %v2575_v7 = vld [vmem:[%s3200_s9 + $0xd8] sm:$0xff] }
  0x87   :  { %776 = vmatpush.msrb.mxu0 %v2524_v62  ;;  %796 = vmatpush.msrb.mxu1 %v2563_v5 }
  0x89   :  { %777 = vmatpush.msrb.mxu0 %v2540_v52  ;;  %797 = vmatpush.msrb.mxu1 %v2575_v7 }
  0x8b   :  { %778 = vmatpush.msrb.mxu0 %v2556_v4  ;;  %798 = vmatpush.msrb.mxu1 %v2587_v11 }
  0x8d   :  { %621 = vmatmul.f32.gmra.mxu0 %v157_v16  ;;  %650 = vmatmul.f32.gmra.mxu1 %v160_v17 }
  0x8e   :  { %679 = vmatmul.f32.gmra.mxu2 %v157_v16  ;;  %708 = vmatmul.f32.gmra.mxu3 %v160_v17  ;;  %v2608_v16 = vld [vmem:[%s3200_s9 + $0x30] sm:$0xff] }
  0x8f   :  { %779 = vmatpush.msrb.mxu0 %v2568_v6  ;;  %799 = vmatpush.msrb.mxu1 %v2603_v15 }
  0x91   :  { %780 = vmatpush.msrb.mxu0 %v2580_v10  ;;  %800 = vmatpush.msrb.mxu1 %v2615_v21 }
  0x93   :  { %781 = vmatpush.msrb.mxu0 %v2592_v12  ;;  %801 = vmatpush.msrb.mxu1 %v2627_v22 }
  0x95   :  { %624 = vmatmul.f32.gmra.mxu0 %v162_v38  ;;  %653 = vmatmul.f32.gmra.mxu1 %v164_v23 }
  0x96   :  { %682 = vmatmul.f32.gmra.mxu2 %v162_v38  ;;  %711 = vmatmul.f32.gmra.mxu3 %v164_v23  ;;  %v2632_v38 = vld [vmem:[%s3200_s9 + $0x20] sm:$0xff]  ;;  %v2639_v23 = vld [vmem:[%s3200_s9 + $0xb0] sm:$0xff] }
  0x97   :  { %782 = vmatpush.msrb.mxu0 %v2608_v16  ;;  %3233 = vst [vmem:[#allocation22_spill] sm:$0xff] %v2632_v38  ;;  %802 = vmatpush.msrb.mxu1 %v2639_v23 }
  0x98   :  { %3234 = vst [vmem:[#allocation23_spill] sm:$0xff] %v2639_v23 }
  0x99   :  { %783 = vmatpush.msrb.mxu0 %v2620_v36  ;;  %803 = vmatpush.msrb.mxu1 %v2651_v59  ;;  %v2684_v59 = vld [vmem:[%s3200_s9] sm:$0xff] }
  0x9a   :  { %3241 = vst [vmem:[#allocation30_spill] sm:$0xff] %v2684_v59 }
  0x9b   :  { %784 = vmatpush.msrb.mxu0 %v2632_v38  ;;  %804 = vmatpush.msrb.mxu1 %v2667_v8  ;;  %v2691_v8 = vld [vmem:[%s3200_s9 + $0x90] sm:$0xff] }
  0x9c   :  { %3242 = vst [vmem:[#allocation31_spill] sm:$0xff] %v2691_v8 }
  0x9d   :  { %785 = vmatpush.msrb.mxu0 %v2644_v19  ;;  %v2672_v19 = vld [vmem:[%s3200_s9 + $0x8] sm:$0xff] }
  0x9e   :  { %3239 = vst [vmem:[#allocation28_spill] sm:$0xff] %v2672_v19 }
  0x9f   :  { %786 = vmatpush.msrb.mxu0 %v2656_v31  ;;  %v2679_v31 = vld [vmem:[%s3200_s9 + $0x98] sm:$0xff] }
  0xa0   :  { %3240 = vst [vmem:[#allocation29_spill] sm:$0xff] %v2679_v31  ;;  %805 = vmatpush.msrb.mxu1 %v2679_v31  ;;  %v2707_v31 = vld [vmem:[%s3200_s9 + $0x80] sm:$0xff] }
  0xa1   :  { %787 = vmatpush.msrb.mxu0 %v2672_v19  ;;  %v2696_v19 = vld [vmem:[%s3200_s9 + $0x88] sm:$0xff] }
  0xa2   :  { %806 = vmatpush.msrb.mxu1 %v2691_v8 }
  0xa3   :  { %788 = vmatpush.msrb.mxu0 %v2684_v59 }
  0xa4   :  { %807 = vmatpush.msrb.mxu1 %v2696_v19 }
  0xa5   :  { %898 = vmatpush.msra.mxu0 %v2501_v56 }
  0xa6   :  { %808 = vmatpush.msrb.mxu1 %v2707_v31 }
  0xa7   :  { %899 = vmatpush.msra.mxu0 %v2507_v57 }
  0xa8   :  { %918 = vmatpush.msra.mxu1 %v2519_v61 }
  0xa9   :  { %900 = vmatpush.msra.mxu0 %v2513_v60 }
  0xaa   :  { %v2446_v24 = vpop.f32.mrf.mxu0  ;;  %v2448_v25 = vpop.f32.mrf.mxu1  ;;  %919 = vmatpush.msra.mxu1 %v2535_v1 }
  0xab   :  { %v349_v59 = vadd.f32 %v2448_v25, %v2446_v24  ;;  %901 = vmatpush.msra.mxu0 %v2524_v62 }
  0xac   :  { %920 = vmatpush.msra.mxu1 %v2547_v2 }
  0xad   :  { %902 = vmatpush.msra.mxu0 %v2540_v52 }
  0xae   :  { %921 = vmatpush.msra.mxu1 %v2563_v5 }
  0xaf   :  { %903 = vmatpush.msra.mxu0 %v2556_v4 }
  0xb0   :  { %922 = vmatpush.msra.mxu1 %v2575_v7 }
  0xb1   :  { %v2450_v26 = vpop.f32.mrf.mxu2  ;;  %v2452_v27 = vpop.f32.mrf.mxu3  ;;  %904 = vmatpush.msra.mxu0 %v2568_v6 }
  0xb2   :  { %923 = vmatpush.msra.mxu1 %v2587_v11  ;;  %v3243_v11 = vld [vmem:[#allocation20_spill] sm:$0xff] }
  0xb3   :  { %905 = vmatpush.msra.mxu0 %v2580_v10 }
  0xb4   :  { %v2454_v28 = vpop.f32.mrf.mxu0  ;;  %v2456_v29 = vpop.f32.mrf.mxu1  ;;  %924 = vmatpush.msra.mxu1 %v2603_v15 }
  0xb5   :  { %v352_v23 = vadd.f32 %v2456_v29, %v2454_v28  ;;  %906 = vmatpush.msra.mxu0 %v2592_v12 }
  0xb6   :  { %925 = vmatpush.msra.mxu1 %v2615_v21  ;;  %v3249_v21 = vld [vmem:[#allocation26_spill] sm:$0xff] }
  0xb7   :  { %907 = vmatpush.msra.mxu0 %v2608_v16 }
  0xb9   :  { %908 = vmatpush.msra.mxu0 %v3243_v11 }
  0xbb   :  { %v2458_v32 = vpop.f32.mrf.mxu2  ;;  %v2460_v33 = vpop.f32.mrf.mxu3 }
  0xbe   :  { %v2462_v34 = vpop.f32.mrf.mxu0  ;;  %v2464_v35 = vpop.f32.mrf.mxu1 }
  0xbf   :  { %v355_v38 = vadd.f32 %v2464_v35, %v2462_v34  ;;  %v816_v35 = vld [vmem:[%s3201_s10 + $0x10] sm:$0xff] }
  0xc0   :  { %836 = vmatpush.msrb.mxu2 %v816_v35 }
  0xc5   :  { %v2466_v37 = vpop.f32.mrf.mxu2  ;;  %v2468_v39 = vpop.f32.mrf.mxu3 }
  0xc8   :  { %v2470_v40 = vpop.f32.mrf.mxu0  ;;  %v2472_v41 = vpop.f32.mrf.mxu1 }
  0xc9   :  { %v358_v34 = vadd.f32 %v2472_v41, %v2470_v40  ;;  %v815_v41 = vld [vmem:[%s3201_s10 + $0x8] sm:$0xff] }
  0xcf   :  { %v2474_v42 = vpop.f32.mrf.mxu2  ;;  %v2476_v43 = vpop.f32.mrf.mxu3 }
  0xd0   :  { %v416_v62 = vadd.f32 %v2476_v43, %v2474_v42 }
  0xd2   :  { %v2478_v44 = vpop.f32.mrf.mxu0  ;;  %v2480_v45 = vpop.f32.mrf.mxu1 }
  0xd3   :  { %v436_v28 = vadd.f32 %v2478_v44, %v349_v59  ;;  %v817_v59 = vld [vmem:[%s3201_s10 + $0x18] sm:$0xff]  ;;  %v814_v44 = vld [vmem:[%s3201_s10] sm:$0xff] }
  0xd4   :  { %856 = vmatpush.msrb.mxu3 %v817_v59  ;;  %837 = vmatpush.msrb.mxu2 %v814_v44 }
  0xd5   :  { %v465_v57 = vadd.f32 %v2480_v45, %v436_v28  ;;  %v3247_v28 = vld [vmem:[#allocation24_spill] sm:$0xff] }
  0xd6   :  { %857 = vmatpush.msrb.mxu3 %v815_v41  ;;  %967 = vmatpush.msra.mxu2 %v816_v35  ;;  %v3250_v35 = vld [vmem:[#allocation27_spill] sm:$0xff] }
  0xd8   :  { %987 = vmatpush.msra.mxu3 %v817_v59  ;;  %968 = vmatpush.msra.mxu2 %v814_v44  ;;  %v3251_v59 = vld [vmem:[#allocation28_spill] sm:$0xff] }
  0xd9   :  { %v2482_v46 = vpop.f32.mrf.mxu2  ;;  %v2484_v47 = vpop.f32.mrf.mxu3 }
  0xda   :  { %988 = vmatpush.msra.mxu3 %v815_v41 }
  0xdc   :  { %v2486_v48 = vpop.f32.mrf.mxu0  ;;  %v2488_v49 = vpop.f32.mrf.mxu1 }
  0xdd   :  { %v439_v56 = vadd.f32 %v2486_v48, %v352_v23  ;;  %v407_v48 = vadd.f32 %v2452_v27, %v2450_v26  ;;  %v413_v26 = vadd.f32 %v2468_v39, %v2466_v37  ;;  %v3245_v23 = vld [vmem:[#allocation22_spill] sm:$0xff] }
  0xde   :  { %909 = vmatpush.msra.mxu0 %v3245_v23  ;;  %v1340_v23 = vld [vmem:[#allocation6 + $0x3f0] sm:$0xff] }
  0xe0   :  { %910 = vmatpush.msra.mxu0 %v3247_v28  ;;  %v1338_v28 = vld [vmem:[#allocation6 + $0x3e0] sm:$0xff] }
  0xe2   :  { %911 = vmatpush.msra.mxu0 %v3249_v21 }
  0xe3   :  { %v2490_v50 = vpop.f32.mrf.mxu2  ;;  %v2492_v51 = vpop.f32.mrf.mxu3 }
  0xe4   :  { %912 = vmatpush.msra.mxu0 %v3251_v59 }
  0xe6   :  { %v2494_v53 = vpop.f32.mrf.mxu0  ;;  %v2496_v55 = vpop.f32.mrf.mxu1 }
  0xe7   :  { %v442_v25 = vadd.f32 %v2494_v53, %v355_v38  ;;  %v410_v53 = vadd.f32 %v2460_v33, %v2458_v32  ;;  %v494_v32 = vadd.f32 %v2482_v46, %v407_v48  ;;  %v3244_v38 = vld [vmem:[#allocation21_spill] sm:$0xff]  ;;  %v3254_v48 = vld [vmem:[#allocation31_spill] sm:$0xff] }
  0xe8   :  { %926 = vmatpush.msra.mxu1 %v3244_v38  ;;  %v1308_v38 = vld [vmem:[#allocation6 + $0x2f0] sm:$0xff] }
  0xe9   :  { %v497_v27 = vadd.f32 %v2490_v50, %v410_v53 }
  0xed   :  { %v2526_v63 = vpop.f32.mrf.mxu2  ;;  %v2528_v0 = vpop.f32.mrf.mxu3 }
  0xee   :  { %v500_v37 = vadd.f32 %v2526_v63, %v413_v26  ;;  %v523_v63 = vadd.f32 %v2484_v47, %v494_v32 }
  0xf0   :  { %v2549_v54 = vpop.f32.mrf.mxu0  ;;  %v2551_v3 = vpop.f32.mrf.mxu1  ;;  %v529_v5 = vadd.f32 %v2528_v0, %v500_v37 }
  0xf1   :  { %v445_v60 = vadd.f32 %v2549_v54, %v358_v34  ;;  %v526_v54 = vadd.f32 %v2492_v51, %v497_v27 }
  0xf3   :  { %v474_v46 = vadd.f32 %v2551_v3, %v445_v60 }
  0xf7   :  { %v2594_v13 = vpop.f32.mrf.mxu2  ;;  %v2596_v14 = vpop.f32.mrf.mxu3 }
  0xf8   :  { %v503_v6 = vadd.f32 %v2594_v13, %v416_v62 }
  0xfa   :  { %v616_v17 = vpop.f32.mrf.mxu0  ;;  %v645_v20 = vpop.f32.mrf.mxu1  ;;  %v532_v0 = vadd.f32 %v2596_v14, %v503_v6 }
 0x101   :  { %v2658_v9 = vpop.f32.mrf.mxu2  ;;  %v2660_v18 = vpop.f32.mrf.mxu3 }
 0x102   :  { %v619_v58 = vpop.f32.mrf.mxu0  ;;  %v648_v30 = vpop.f32.mrf.mxu1  ;;  %v704_v42 = vadd.f32 %v2660_v18, %v2658_v9 }
 0x103   :  { %v649_v8 = vadd.f32 %v648_v30, %v619_v58  ;;  %v468_v30 = vadd.f32 %v2488_v49, %v439_v56  ;;  %v646_v58 = vadd.f32 %v645_v20, %v616_v17  ;;  %v471_v49 = vadd.f32 %v2496_v55, %v442_v25  ;;  %v3246_v56 = vld [vmem:[#allocation23_spill] sm:$0xff] }
 0x104   :  { %v716_v18 = vadd.f32 %v704_v42, %v523_v63  ;;  %927 = vmatpush.msra.mxu1 %v3246_v56  ;;  %v1306_v56 = vld [vmem:[#allocation6 + $0x2e0] sm:$0xff] }
 0x105   :  { %v2744_v61 = vadd.f32 %v649_v8, %v468_v30  ;;  %v2752_v33 = vadd.f32 %v646_v58, %v465_v57  ;;  %v3252_v58 = vld [vmem:[#allocation29_spill] sm:$0xff] }
 0x107   :  { %v723_v52 = vadd.f32 %v2744_v61, %v2752_v33 }
 0x109   :  { %v677_v22 = vpop.f32.mrf.mxu2  ;;  %v706_v36 = vpop.f32.mrf.mxu3 }
 0x10a   :  { %v622_v29 = vpop.f32.mrf.mxu0  ;;  %v651_v24 = vpop.f32.mrf.mxu1  ;;  %v707_v39 = vadd.f32 %v706_v36, %v677_v22 }
 0x10b   :  { %v652_v40 = vadd.f32 %v651_v24, %v622_v29  ;;  %v3248_v24 = vld [vmem:[#allocation25_spill] sm:$0xff] }
 0x10c   :  { %v718_v17 = vadd.f32 %v707_v39, %v526_v54  ;;  %928 = vmatpush.msra.mxu1 %v3248_v24 }
 0x10d   :  { %v2754_v45 = vadd.f32 %v652_v40, %v471_v49  ;;  %v3253_v40 = vld [vmem:[#allocation30_spill] sm:$0xff] }
 0x10e   :  { %v732_v20 = vadd.f32 %v718_v17, %v716_v18  ;;  %929 = vmatpush.msra.mxu1 %v3250_v35  ;;  %913 = vmatpush.msra.mxu0 %v3253_v40 }
 0x10f   :  { %v724_v3 = vadd.f32 %v723_v52, %v2754_v45 }
 0x110   :  { %930 = vmatpush.msra.mxu1 %v3252_v58 }
 0x111   :  { %v680_v55 = vpop.f32.mrf.mxu2  ;;  %v709_v8 = vpop.f32.mrf.mxu3 }
 0x112   :  { %v625_v50 = vpop.f32.mrf.mxu0  ;;  %v654_v1 = vpop.f32.mrf.mxu1  ;;  %v710_v43 = vadd.f32 %v709_v8, %v680_v55  ;;  %931 = vmatpush.msra.mxu1 %v3254_v48 }
 0x113   :  { %v655_v2 = vadd.f32 %v654_v1, %v625_v50 }
 0x114   :  { %v720_v51 = vadd.f32 %v710_v43, %v529_v5  ;;  %932 = vmatpush.msra.mxu1 %v2696_v19 }
 0x115   :  { %v2771_v4 = vadd.f32 %v655_v2, %v474_v46 }
 0x116   :  { %v733_v36 = vadd.f32 %v732_v20, %v720_v51  ;;  %933 = vmatpush.msra.mxu1 %v2707_v31 }
 0x117   :  { %v725_v9 = vadd.f32 %v724_v3, %v2771_v4 }
 0x119   :  { %v726_v47 = vrot.slane %v725_v9, 4  ;;  %v683_v7 = vpop.f32.mrf.mxu2  ;;  %v712_v10 = vpop.f32.mrf.mxu3 }
 0x11a   :  { %v713_v13 = vadd.f32 %v712_v10, %v683_v7 }
 0x11b   :  { %v727_v12 = vadd.f32 %v726_v47, %v725_v9 }
 0x11c   :  { %v722_v22 = vadd.f32 %v713_v13, %v532_v0 }
 0x11d   :  { %v728_v15 = vrot.slane %v727_v12, 2 }
 0x11e   :  { %v734_v16 = vadd.f32 %v733_v36, %v722_v22 }
 0x11f   :  { %v729_v14 = vadd.f32 %v728_v15, %v727_v12  ;;  %v1309_v15 = vld [vmem:[#allocation6 + $0x2f8] sm:$0xff] }
 0x120   :  { %v735_v29 = vrot.slane %v734_v16, 4 }
 0x121   :  { %v730_v25 = vrot.slane %v729_v14, 1 }
 0x122   :  { %v736_v34 = vadd.f32 %v735_v29, %v734_v16  ;;  %v1341_v16 = vld [vmem:[#allocation6 + $0x3f8] sm:$0xff]  ;;  %v1339_v29 = vld [vmem:[#allocation6 + $0x3e8] sm:$0xff] }
 0x123   :  { %v731_v44 = vadd.f32 %v730_v25, %v729_v14  ;;  %v1307_v14 = vld [vmem:[#allocation6 + $0x2e8] sm:$0xff] }
 0x124   :  { %v737_v30 = vrot.slane %v736_v34, 2 }
 0x125   :  { %789 = vmatmul.f32.vlgmr.msrb.gmra.mxu0 %v731_v44 }
 0x126   :  { %v738_v41 = vadd.f32 %v737_v30, %v736_v34  ;;  %1400 = vmatpush.msrb.mxu0 %v1309_v15  ;;  %v1286_v15 = vld [vmem:[#allocation6 + $0x240] sm:$0xff] }
 0x128   :  { %v739_v53 = vrot.slane %v738_v41, 1  ;;  %1401 = vmatpush.msrb.mxu0 %v1307_v14  ;;  %v1319_v14 = vld [vmem:[#allocation6 + $0x348] sm:$0xff] }
 0x12a   :  { %v740_v57 = vadd.f32 %v739_v53, %v738_v41  ;;  %v1304_v53 = vld [vmem:[#allocation6 + $0x2d0] sm:$0xff] }
 0x12c   :  { %809 = vmatmul.f32.vlgmr.msrb.gmra.mxu1 %v740_v57  ;;  %v1336_v57 = vld [vmem:[#allocation6 + $0x3d0] sm:$0xff] }
 0x12d   :  { %1429 = vmatpush.msrb.mxu1 %v1341_v16  ;;  %v1318_v16 = vld [vmem:[#allocation6 + $0x340] sm:$0xff] }
 0x12f   :  { %1430 = vmatpush.msrb.mxu1 %v1339_v29  ;;  %v1284_v29 = vld [vmem:[#allocation6 + $0x230] sm:$0xff] }
 0x1a2   :  { %v790_v49 = vpop.f32.mrf.mxu0 }
 0x1a9   :  { %v810_v60 = vpop.f32.mrf.mxu1 }
 0x1aa   :  { %v811_v26 = vadd.f32 %v810_v60, %v790_v49  ;;  %v1305_v49 = vld [vmem:[#allocation6 + $0x2d8] sm:$0xff] }
 0x1ab   :  { %v1337_v60 = vld [vmem:[#allocation6 + $0x3d8] sm:$0xff]  ;;  %1402 = vmatpush.msrb.mxu0 %v1305_v49 }
 0x1ac   :  { %v813_v27 = vmul.f32 0.001953125, %v811_v26  ;;  %1431 = vmatpush.msrb.mxu1 %v1337_v60  ;;  %v1302_v26 = vld [vmem:[#allocation6 + $0x2c0] sm:$0xff]  ;;  %v1281_v49 = vld [vmem:[#allocation6 + $0x218] sm:$0xff] }
 0x1ae   :  { %2128 = vmatmul.msk.f32.vlgmr.msrb.gmra.mxu2 %vm818_vm2, %v813_v27  ;;  %2129 = vmatmul.msk.f32.vlgmr.msrb.gmra.mxu3 %vm818_vm2, %v813_v27  ;;  %v1334_v27 = vld [vmem:[#allocation6 + $0x3c0] sm:$0xff] }
 0x1af   :  { %1342 = vmatpush.msrb.mxu2 %v1308_v38  ;;  %1371 = vmatpush.msrb.mxu3 %v1340_v23  ;;  %v1321_v23 = vld [vmem:[#allocation6 + $0x358] sm:$0xff] }
 0x1b1   :  { %1343 = vmatpush.msrb.mxu2 %v1306_v56  ;;  %1372 = vmatpush.msrb.mxu3 %v1338_v28  ;;  %v2228_v56 = vmov 0.0   ;;  %v1287_v28 = vld [vmem:[#allocation6 + $0x248] sm:$0xff] }
 0x1b3   :  { %1344 = vmatpush.msrb.mxu2 %v1304_v53  ;;  %1373 = vmatpush.msrb.mxu3 %v1336_v57 }
 0x1b5   :  { %1345 = vmatpush.msrb.mxu2 %v1302_v26  ;;  %1374 = vmatpush.msrb.mxu3 %v1334_v27 }
 0x231   :  { %v839_v32 = vpop.f32.mrf.mxu2  ;;  %v859_v55 = vpop.f32.mrf.mxu3 }
 0x232   :  { %v862_v8 = vperm.slane %v839_v32, 0  ;;  %v863_v62 = vperm.slane %v859_v55, 0  ;;  %v1303_v32 = vld [vmem:[#allocation6 + $0x2c8] sm:$0xff] }
 0x233   :  { %v1335_v55 = vld [vmem:[#allocation6 + $0x3c8] sm:$0xff]  ;;  %1403 = vmatpush.msrb.mxu0 %v1303_v32 }
 0x234   :  { %v2799_v37 = vsub.f32 %v2752_v33, %v862_v8  ;;  %v2802_v19 = vsub.f32 %v2744_v61, %v862_v8  ;;  %v2805_v31 = vsub.f32 %v2754_v45, %v862_v8  ;;  %v2807_v39 = vsub.f32 %v716_v18, %v863_v62  ;;  %1432 = vmatpush.msrb.mxu1 %v1335_v55  ;;  %v1313_v55 = vld [vmem:[#allocation6 + $0x318] sm:$0xff] }
 0x235   :  { %v2809_v50 = vsub.f32 %v718_v17, %v863_v62  ;;  %v2811_v1 = vsub.f32 %v720_v51, %v863_v62  ;;  %v2814_v46 = vsub.f32 %v2771_v4, %v862_v8  ;;  %v2820_v61 = vsub.f32 %v722_v22, %v863_v62  ;;  %v1300_v8 = vld [vmem:[#allocation6 + $0x2b0] sm:$0xff] }
 0x236   :  { %v872_v52 = vmul.f32 %v2799_v37, %v2799_v37  ;;  %v874_v33 = vmul.f32 %v2802_v19, %v2802_v19  ;;  %v873_v45 = vmul.f32 %v2807_v39, %v2807_v39  ;;  %v876_v54 = vmul.f32 %v2805_v31, %v2805_v31  ;;  %v1332_v62 = vld [vmem:[#allocation6 + $0x3b0] sm:$0xff]  ;;  %1346 = vmatpush.msrb.mxu2 %v1300_v8 }
 0x237   :  { %v875_v2 = vmul.f32 %v2809_v50, %v2809_v50  ;;  %v877_v43 = vmul.f32 %v2811_v1, %v2811_v1  ;;  %v878_v3 = vmul.f32 %v2814_v46, %v2814_v46  ;;  %v879_v5 = vmul.f32 %v2820_v61, %v2820_v61  ;;  %1375 = vmatpush.msrb.mxu3 %v1332_v62 }
 0x238   :  { %v880_v42 = vadd.f32 %v874_v33, %v872_v52  ;;  %v1301_v52 = vld [vmem:[#allocation6 + $0x2b8] sm:$0xff] }
 0x239   :  { %v889_v63 = vadd.f32 %v875_v2, %v873_v45  ;;  %v1333_v33 = vld [vmem:[#allocation6 + $0x3b8] sm:$0xff]  ;;  %1404 = vmatpush.msrb.mxu0 %v1301_v52  ;;  %v1298_v45 = vld [vmem:[#allocation6 + $0x2a0] sm:$0xff] }
 0x23a   :  { %v881_v4 = vadd.f32 %v880_v42, %v876_v54  ;;  %1433 = vmatpush.msrb.mxu1 %v1333_v33  ;;  %v1330_v2 = vld [vmem:[#allocation6 + $0x3a0] sm:$0xff]  ;;  %v1299_v54 = vld [vmem:[#allocation6 + $0x2a8] sm:$0xff]  ;;  %1347 = vmatpush.msrb.mxu2 %v1298_v45 }
 0x23b   :  { %v890_v6 = vadd.f32 %v889_v63, %v877_v43  ;;  %1376 = vmatpush.msrb.mxu3 %v1330_v2  ;;  %v1331_v42 = vld [vmem:[#allocation6 + $0x3a8] sm:$0xff]  ;;  %1405 = vmatpush.msrb.mxu0 %v1299_v54  ;;  %v1296_v43 = vld [vmem:[#allocation6 + $0x290] sm:$0xff]  ;;  %v1278_v45 = vld [vmem:[#allocation6 + $0x200] sm:$0xff] }
 0x23c   :  { %v882_v17 = vadd.f32 %v881_v4, %v878_v3  ;;  %1434 = vmatpush.msrb.mxu1 %v1331_v42  ;;  %v1328_v63 = vld [vmem:[#allocation6 + $0x390] sm:$0xff]  ;;  %v1297_v3 = vld [vmem:[#allocation6 + $0x298] sm:$0xff]  ;;  %1348 = vmatpush.msrb.mxu2 %v1296_v43 }
 0x23d   :  { %v891_v9 = vadd.f32 %v890_v6, %v879_v5  ;;  %1377 = vmatpush.msrb.mxu3 %v1328_v63  ;;  %v1329_v4 = vld [vmem:[#allocation6 + $0x398] sm:$0xff]  ;;  %1406 = vmatpush.msrb.mxu0 %v1297_v3  ;;  %v1294_v5 = vld [vmem:[#allocation6 + $0x280] sm:$0xff] }
 0x23e   :  { %v883_v18 = vrot.slane %v882_v17, 4  ;;  %1435 = vmatpush.msrb.mxu1 %v1329_v4  ;;  %v1326_v6 = vld [vmem:[#allocation6 + $0x380] sm:$0xff]  ;;  %1349 = vmatpush.msrb.mxu2 %v1294_v5 }
 0x23f   :  { %v892_v51 = vrot.slane %v891_v9, 4  ;;  %1378 = vmatpush.msrb.mxu3 %v1326_v6  ;;  %v1310_v63 = vld [vmem:[#allocation6 + $0x300] sm:$0xff] }
 0x240   :  { %v884_v47 = vadd.f32 %v883_v18, %v882_v17  ;;  %v1295_v17 = vld [vmem:[#allocation6 + $0x288] sm:$0xff]  ;;  %v1292_v18 = vld [vmem:[#allocation6 + $0x270] sm:$0xff] }
 0x241   :  { %v893_v7 = vadd.f32 %v892_v51, %v891_v9  ;;  %v1327_v9 = vld [vmem:[#allocation6 + $0x388] sm:$0xff]  ;;  %1407 = vmatpush.msrb.mxu0 %v1295_v17  ;;  %v1324_v51 = vld [vmem:[#allocation6 + $0x370] sm:$0xff]  ;;  %1350 = vmatpush.msrb.mxu2 %v1292_v18 }
 0x242   :  { %v885_v10 = vrot.slane %v884_v47, 2  ;;  %1436 = vmatpush.msrb.mxu1 %v1327_v9  ;;  %1379 = vmatpush.msrb.mxu3 %v1324_v51  ;;  %v1279_v17 = vld [vmem:[#allocation6 + $0x208] sm:$0xff] }
 0x243   :  { %v894_v0 = vrot.slane %v893_v7, 2 }
 0x244   :  { %v886_v20 = vadd.f32 %v885_v10, %v884_v47  ;;  %v1293_v47 = vld [vmem:[#allocation6 + $0x278] sm:$0xff]  ;;  %v1290_v10 = vld [vmem:[#allocation6 + $0x260] sm:$0xff] }
 0x245   :  { %v895_v13 = vadd.f32 %v894_v0, %v893_v7  ;;  %v1325_v7 = vld [vmem:[#allocation6 + $0x378] sm:$0xff]  ;;  %1408 = vmatpush.msrb.mxu0 %v1293_v47  ;;  %v1322_v0 = vld [vmem:[#allocation6 + $0x360] sm:$0xff]  ;;  %1351 = vmatpush.msrb.mxu2 %v1290_v10 }
 0x246   :  { %v887_v11 = vrot.slane %v886_v20, 1  ;;  %1437 = vmatpush.msrb.mxu1 %v1325_v7  ;;  %1380 = vmatpush.msrb.mxu3 %v1322_v0 }
 0x247   :  { %v896_v12 = vrot.slane %v895_v13, 1 }
 0x248   :  { %v888_v36 = vadd.f32 %v887_v11, %v886_v20  ;;  %v1291_v20 = vld [vmem:[#allocation6 + $0x268] sm:$0xff] }
 0x249   :  { %v897_v22 = vadd.f32 %v896_v12, %v895_v13  ;;  %v1053_v13 = vlaneseq  ;;  %v1323_v11 = vld [vmem:[#allocation6 + $0x368] sm:$0xff]  ;;  %1409 = vmatpush.msrb.mxu0 %v1291_v20  ;;  %v1288_v12 = vld [vmem:[#allocation6 + $0x250] sm:$0xff] }
 0x24a   :  { %914 = vmatmul.f32.vlgmr.msra.gmra.mxu0 %v888_v36  ;;  %1438 = vmatpush.msrb.mxu1 %v1323_v11  ;;  %v1320_v36 = vld [vmem:[#allocation6 + $0x350] sm:$0xff] }
 0x24b   :  { %934 = vmatmul.f32.vlgmr.msra.gmra.mxu1 %v897_v22  ;;  %v1289_v22 = vld [vmem:[#allocation6 + $0x258] sm:$0xff]  ;;  %vm2836_vm6 = vcmp.lt.s32.totalorder %v1053_v13, 256  ;;  %1352 = vmatpush.msrb.mxu2 %v1288_v12 }
 0x24c   :  { %1381 = vmatpush.msrb.mxu3 %v1320_v36  ;;  %1057 = vst.msk [vmem:[#allocation2] ss:$8 sm:$0x3] %vm2836_vm6, %v2228_v56  ;;  %1410 = vmatpush.msrb.mxu0 %v1289_v22  ;;  %v1244_v36 = vld [vmem:[#allocation6 + $0xf8] sm:$0xff] }
 0x24d   :  { %1439 = vmatpush.msrb.mxu1 %v1321_v23  ;;  %1060 = vst.msk [vmem:[#allocation2 + $0x30] ss:$8 sm:$0x3] %vm2836_vm6, %v2228_v56  ;;  %1353 = vmatpush.msrb.mxu2 %v1286_v15  ;;  %v1276_v22 = vld [vmem:[#allocation6 + $0x1f8] sm:$0xff] }
 0x24e   :  { %1382 = vmatpush.msrb.mxu3 %v1318_v16  ;;  %1063 = vst.msk [vmem:[#allocation2 + $0x21] ss:$8 sm:$0x3] %vm2836_vm6, %v2228_v56  ;;  %1411 = vmatpush.msrb.mxu0 %v1287_v28  ;;  %v1273_v28 = vld [vmem:[#allocation6 + $0x1e0] sm:$0xff] }
 0x24f   :  { %1440 = vmatpush.msrb.mxu1 %v1319_v14  ;;  %1066 = vst.msk [vmem:[#allocation2 + $0x51] ss:$8 sm:$0x3] %vm2836_vm6, %v2228_v56  ;;  %1354 = vmatpush.msrb.mxu2 %v1284_v29  ;;  %v1241_v56 = vld [vmem:[#allocation6 + $0xe0] sm:$0xff] }
 0x2c7   :  { %v915_v24 = vpop.f32.mrf.mxu0 }
 0x2c8   :  { %v935_v21 = vpop.f32.mrf.mxu1 }
 0x2c9   :  { %v936_v25 = vadd.f32 %v935_v21, %v915_v24  ;;  %v1003_v24 = vld [vmem:[%s3193_s2] sm:$0x3]  ;;  %v1316_v21 = vld [vmem:[#allocation6 + $0x330] sm:$0xff] }
 0x2ca   :  { %1383 = vmatpush.msrb.mxu3 %v1316_v21  ;;  %v1005_v26 = vperm.slane %v1003_v24, 0  ;;  %v1006_v62 = vperm.slane %v1003_v24, 1 }
 0x2cb   :  { %v938_v34 = vmul.f32 0.001953125, %v936_v25  ;;  %v1285_v25 = vld [vmem:[#allocation6 + $0x238] sm:$0xff] }
 0x2cc   :  { %1412 = vmatpush.msrb.mxu0 %v1285_v25  ;;  %v1242_v25 = vld [vmem:[#allocation6 + $0xe8] sm:$0xff] }
 0x2cd   :  { %v939_v35 = vadd.f32 1e-05, %v938_v34  ;;  %v1317_v34 = vld [vmem:[#allocation6 + $0x338] sm:$0xff] }
 0x2ce   :  { %1441 = vmatpush.msrb.mxu1 %v1317_v34  ;;  %v1274_v34 = vld [vmem:[#allocation6 + $0x1e8] sm:$0xff] }
 0x2cf   :  { %2142 = vrsqrt.f32 %v939_v35  ;;  %vm946_vm4 = vweird.f32 %v939_v35 }
 0x2d5   :  { %v2143_v59 = vpop.eup %2142 }
 0x2d6   :  { %v941_v44 = vmul.f32 %v2143_v59, %v939_v35  ;;  %vm947_vm3 = vweird.f32 %v2143_v59  ;;  %v1282_v35 = vld [vmem:[#allocation6 + $0x220] sm:$0xff] }
 0x2d7   :  { %vm948_vm5 = vmor %vm946_vm4, %vm947_vm3  ;;  %1355 = vmatpush.msrb.mxu2 %v1282_v35 }
 0x2d8   :  { %v942_v30 = vmul.f32 %v2143_v59, %v941_v44  ;;  %v1017_v44 = vld [vmem:[%s3194_s3] sm:$0x3] }
 0x2d9   :  { %v1019_v27 = vperm.slane %v1017_v44, 0  ;;  %v1020_v52 = vperm.slane %v1017_v44, 1 }
 0x2da   :  { %v943_v58 = vmul.f32 0.5, %v942_v30  ;;  %v1283_v30 = vld [vmem:[#allocation6 + $0x228] sm:$0xff] }
 0x2db   :  { %1413 = vmatpush.msrb.mxu0 %v1283_v30 }
 0x2dc   :  { %v944_v40 = vsub.f32 1.5, %v943_v58  ;;  %v1315_v58 = vld [vmem:[#allocation6 + $0x328] sm:$0xff] }
 0x2dd   :  { %1442 = vmatpush.msrb.mxu1 %v1315_v58  ;;  %1414 = vmatpush.msrb.mxu0 %v1281_v49  ;;  %v1239_v58 = vld [vmem:[#allocation6 + $0xd0] sm:$0xff] }
 0x2de   :  { %v945_v41 = vmul.f32 %v2143_v59, %v944_v40  ;;  %v1031_v40 = vld [vmem:[%s3195_s4] sm:$0x3] }
 0x2df   :  { %v1033_v8 = vperm.slane %v1031_v40, 0  ;;  %v1034_v33 = vperm.slane %v1031_v40, 1  ;;  %1443 = vmatpush.msrb.mxu1 %v1313_v55  ;;  %1415 = vmatpush.msrb.mxu0 %v1279_v17  ;;  %v1271_v40 = vld [vmem:[#allocation6 + $0x1d0] sm:$0xff]  ;;  %v1269_v55 = vld [vmem:[#allocation6 + $0x1c0] sm:$0xff] }
 0x2e0   :  { %v949_v48 = vsel %vm948_vm5, %v2143_v59, %v945_v41  ;;  %v1314_v59 = vld [vmem:[#allocation6 + $0x320] sm:$0xff]  ;;  %v1280_v41 = vld [vmem:[#allocation6 + $0x210] sm:$0xff] }
 0x2e1   :  { %2130 = vmatmul.msk.f32.vlgmr.msra.gmra.mxu2 %vm818_vm2, %v949_v48  ;;  %2131 = vmatmul.msk.f32.vlgmr.msra.gmra.mxu3 %vm818_vm2, %v949_v48  ;;  %v1312_v48 = vld [vmem:[#allocation6 + $0x310] sm:$0xff] }
 0x2e2   :  { %1384 = vmatpush.msrb.mxu3 %v1314_v59  ;;  %1356 = vmatpush.msrb.mxu2 %v1280_v41 }
 0x2e3   :  { %1516 = vmatpush.msra.mxu0 %v1244_v36  ;;  %v1228_v36 = vld [vmem:[#allocation6 + $0x78] sm:$0xff] }
 0x2e4   :  { %1385 = vmatpush.msrb.mxu3 %v1312_v48  ;;  %1357 = vmatpush.msrb.mxu2 %v1278_v45 }
 0x2e5   :  { %1517 = vmatpush.msra.mxu0 %v1242_v25 }
 0x2e6   :  { %1386 = vmatpush.msrb.mxu3 %v1310_v63 }
 0x364   :  { %v970_v53 = vpop.f32.mrf.mxu2  ;;  %v990_v57 = vpop.f32.mrf.mxu3 }
 0x365   :  { %v993_v60 = vperm.slane %v970_v53, 0  ;;  %v994_v32 = vperm.slane %v990_v57, 0  ;;  %v1240_v53 = vld [vmem:[#allocation6 + $0xd8] sm:$0xff] }
 0x366   :  { %v1272_v57 = vld [vmem:[#allocation6 + $0x1d8] sm:$0xff]  ;;  %1518 = vmatpush.msra.mxu0 %v1240_v53 }
 0x367   :  { %v995_v2 = vmul.f32 %v993_v60, %v2799_v37  ;;  %v997_v54 = vmul.f32 %v993_v60, %v2802_v19  ;;  %v999_v42 = vmul.f32 %v993_v60, %v2805_v31  ;;  %v1001_v43 = vmul.f32 %v993_v60, %v2814_v46  ;;  %v1311_v31 = vld [vmem:[#allocation6 + $0x308] sm:$0xff] }
 0x368   :  { %v996_v3 = vmul.f32 %v994_v32, %v2807_v39  ;;  %v998_v4 = vmul.f32 %v994_v32, %v2809_v50  ;;  %v1000_v5 = vmul.f32 %v994_v32, %v2811_v1  ;;  %v1002_v6 = vmul.f32 %v994_v32, %v2820_v61  ;;  %v1243_v39 = vld [vmem:[#allocation6 + $0xf0] sm:$0xff]  ;;  %1444 = vmatpush.msrb.mxu1 %v1311_v31  ;;  %v1237_v32 = vld [vmem:[#allocation6 + $0xc0] sm:$0xff] }
 0x369   :  { %v1009_v9 = vmul.f32 %v1005_v26, %v995_v2  ;;  %v1011_v37 = vmul.f32 %v1005_v26, %v997_v54  ;;  %v1013_v18 = vmul.f32 %v1005_v26, %v999_v42  ;;  %v1015_v19 = vmul.f32 %v1005_v26, %v1001_v43  ;;  %v1275_v61 = vld [vmem:[#allocation6 + $0x1f0] sm:$0xff]  ;;  %1458 = vmatpush.msra.mxu2 %v1243_v39  ;;  %v1261_v39 = vld [vmem:[#allocation6 + $0x180] sm:$0xff] }
 0x36a   :  { %v1010_v51 = vmul.f32 %v1006_v62, %v996_v3  ;;  %v1012_v46 = vmul.f32 %v1006_v62, %v998_v4  ;;  %v1014_v47 = vmul.f32 %v1006_v62, %v1000_v5  ;;  %v1016_v7 = vmul.f32 %v1006_v62, %v1002_v6  ;;  %1487 = vmatpush.msra.mxu3 %v1275_v61  ;;  %v1235_v42 = vld [vmem:[#allocation6 + $0xb0] sm:$0xff]  ;;  %v1236_v3 = vld [vmem:[#allocation6 + $0xb8] sm:$0xff]  ;;  %v1233_v5 = vld [vmem:[#allocation6 + $0xa0] sm:$0xff] }
 0x36b   :  { %v1023_v10 = vadd.f32 %v1019_v27, %v1009_v9  ;;  %v1025_v50 = vadd.f32 %v1019_v27, %v1011_v37  ;;  %v1027_v0 = vadd.f32 %v1019_v27, %v1013_v18  ;;  %v1029_v1 = vadd.f32 %v1019_v27, %v1015_v19  ;;  %1545 = vmatpush.msra.mxu1 %v1276_v22  ;;  %v1267_v43 = vld [vmem:[#allocation6 + $0x1b0] sm:$0xff]  ;;  %v1268_v4 = vld [vmem:[#allocation6 + $0x1b8] sm:$0xff]  ;;  %v1265_v6 = vld [vmem:[#allocation6 + $0x1a0] sm:$0xff] }
 0x36c   :  { %v1024_v20 = vadd.f32 %v1020_v52, %v1010_v51  ;;  %v1026_v13 = vadd.f32 %v1020_v52, %v1012_v46  ;;  %v1028_v11 = vadd.f32 %v1020_v52, %v1014_v47  ;;  %v1030_v12 = vadd.f32 %v1020_v52, %v1016_v7  ;;  %1459 = vmatpush.msra.mxu2 %v1241_v56  ;;  %v1238_v52 = vld [vmem:[#allocation6 + $0xc8] sm:$0xff]  ;;  %v1231_v31 = vld [vmem:[#allocation6 + $0x90] sm:$0xff]  ;;  %v1232_v46 = vld [vmem:[#allocation6 + $0x98] sm:$0xff] }
 0x36d   :  { %v1037_v38 = vadd.f32 %v1033_v8, %v1023_v10  ;;  %v1039_v23 = vadd.f32 %v1033_v8, %v1025_v50  ;;  %v1041_v15 = vadd.f32 %v1033_v8, %v1027_v0  ;;  %v1043_v16 = vadd.f32 %v1033_v8, %v1029_v1  ;;  %1488 = vmatpush.msra.mxu3 %v1273_v28  ;;  %v1234_v37 = vld [vmem:[#allocation6 + $0xa8] sm:$0xff]  ;;  %v1263_v51 = vld [vmem:[#allocation6 + $0x190] sm:$0xff]  ;;  %v1264_v47 = vld [vmem:[#allocation6 + $0x198] sm:$0xff] }
 0x36e   :  { %v1038_v14 = vadd.f32 %v1034_v33, %v1024_v20  ;;  %v1040_v29 = vadd.f32 %v1034_v33, %v1026_v13  ;;  %v1042_v24 = vadd.f32 %v1034_v33, %v1028_v11  ;;  %v1044_v21 = vadd.f32 %v1034_v33, %v1030_v12  ;;  %1546 = vmatpush.msra.mxu1 %v1274_v34  ;;  %v1270_v33 = vld [vmem:[#allocation6 + $0x1c8] sm:$0xff]  ;;  %v1229_v7 = vld [vmem:[#allocation6 + $0x80] sm:$0xff]  ;;  %v1227_v13 = vld [vmem:[#allocation6 + $0x70] sm:$0xff] }
 0x36f   :  { %v1045_v35 = vmax.f32 %v1037_v38, 0.0  ;;  %v1047_v59 = vmax.f32 %v1039_v23, 0.0  ;;  %v1049_v44 = vmax.f32 %v1041_v15, 0.0  ;;  %v1051_v30 = vmax.f32 %v1043_v16, 0.0  ;;  %1460 = vmatpush.msra.mxu2 %v1239_v58  ;;  %1489 = vmatpush.msra.mxu3 %v1271_v40  ;;  %v1266_v18 = vld [vmem:[#allocation6 + $0x1a8] sm:$0xff]  ;;  %v1259_v11 = vld [vmem:[#allocation6 + $0x170] sm:$0xff] }
 0x370   :  { %v1046_v41 = vmax.f32 %v1038_v14, 0.0  ;;  %v1048_v48 = vmax.f32 %v1040_v29, 0.0  ;;  %v1050_v8 = vmax.f32 %v1042_v24, 0.0  ;;  %v1052_v62 = vmax.f32 %v1044_v21, 0.0  ;;  %1547 = vmatpush.msra.mxu1 %v1272_v57  ;;  %1519 = vmatpush.msra.mxu0 %v1238_v52  ;;  %v1230_v0 = vld [vmem:[#allocation6 + $0x88] sm:$0xff]  ;;  %v1260_v22 = vld [vmem:[#allocation6 + $0x178] sm:$0xff] }
 0x371   :  { %v1077_v49 = vrot.slane %v1045_v35, 7  ;;  %v1079_v60 = vrot.slane %v1047_v59, 7  ;;  %v1083_v26 = vrot.slane %v1049_v44, 7  ;;  %v1085_v27 = vrot.slane %v1051_v30, 7  ;;  %1461 = vmatpush.msra.mxu2 %v1237_v32  ;;  %1490 = vmatpush.msra.mxu3 %v1269_v55  ;;  %v1262_v1 = vld [vmem:[#allocation6 + $0x188] sm:$0xff]  ;;  %v1225_v23 = vld [vmem:[#allocation6 + $0x60] sm:$0xff] }
 0x372   :  { %v1078_v2 = vrot.slane %v1046_v41, 7  ;;  %v1081_v54 = vrot.slane %v1048_v48, 7  ;;  %1548 = vmatpush.msra.mxu1 %v1270_v33  ;;  %v1084_v17 = vrot.slane %v1050_v8, 7  ;;  %v1087_v9 = vrot.slane %v1052_v62, 7  ;;  %1520 = vmatpush.msra.mxu0 %v1236_v3  ;;  %v1257_v15 = vld [vmem:[#allocation6 + $0x160] sm:$0xff]  ;;  %v1226_v16 = vld [vmem:[#allocation6 + $0x68] sm:$0xff] }
 0x373   :  { %v2866_v45 = vsel %vm1076_vm7, %v1077_v49, %v1079_v60  ;;  %1101 = vst [vmem:[#allocation2] sm:$0xfe] %v1077_v49  ;;  %v2869_v63 = vsel %vm1076_vm7, %v1083_v26, %v1085_v27  ;;  %1462 = vmatpush.msra.mxu2 %v1235_v42  ;;  %1491 = vmatpush.msra.mxu3 %v1267_v43  ;;  %v1258_v56 = vld [vmem:[#allocation6 + $0x168] sm:$0xff]  ;;  %v1223_v14 = vld [vmem:[#allocation6 + $0x50] sm:$0xff]  ;;  %v1224_v34 = vld [vmem:[#allocation6 + $0x58] sm:$0xff] }
 0x374   :  { %1105 = vst [vmem:[#allocation2 + $0x20] sm:$0x1] %v1079_v60  ;;  %v2872_v19 = vsel %vm1076_vm7, %v1078_v2, %v1081_v54  ;;  %1549 = vmatpush.msra.mxu1 %v1268_v4  ;;  %1521 = vmatpush.msra.mxu0 %v1234_v37  ;;  %v2875_v10 = vsel %vm1076_vm7, %v1084_v17, %v1087_v9  ;;  %v1142_v20 = vrot.slane %v2866_v45, 1  ;;  %v1255_v29 = vld [vmem:[#allocation6 + $0x150] sm:$0xff]  ;;  %v1256_v35 = vld [vmem:[#allocation6 + $0x158] sm:$0xff]  ;;  %v1221_v30 = vld [vmem:[#allocation6 + $0x40] sm:$0xff] }
 0x375   :  { %1107 = vst [vmem:[#allocation2 + $0x30] sm:$0xfe] %v1083_v26  ;;  %1463 = vmatpush.msra.mxu2 %v1233_v5  ;;  %1492 = vmatpush.msra.mxu3 %v1265_v6  ;;  %v1145_v21 = vrot.slane %v2872_v19, 1  ;;  %v1253_v58 = vld [vmem:[#allocation6 + $0x140] sm:$0xff]  ;;  %v1222_v41 = vld [vmem:[#allocation6 + $0x48] sm:$0xff]  ;;  %v1219_v57 = vld [vmem:[#allocation6 + $0x30] sm:$0xff] }
 0x376   :  { %1111 = vst [vmem:[#allocation2 + $0x50] sm:$0x1] %v1085_v27  ;;  %1550 = vmatpush.msra.mxu1 %v1266_v18  ;;  %1522 = vmatpush.msra.mxu0 %v1232_v46  ;;  %v1254_v48 = vld [vmem:[#allocation6 + $0x148] sm:$0xff]  ;;  %v1251_v49 = vld [vmem:[#allocation6 + $0x130] sm:$0xff]  ;;  %v1220_v26 = vld [vmem:[#allocation6 + $0x38] sm:$0xff] }
 0x377   :  { %1102 = vst [vmem:[#allocation2 + $0x8] sm:$0xfe] %v1078_v2  ;;  %1464 = vmatpush.msra.mxu2 %v1231_v31  ;;  %1493 = vmatpush.msra.mxu3 %v1263_v51  ;;  %v1252_v27 = vld [vmem:[#allocation6 + $0x138] sm:$0xff]  ;;  %v1217_v32 = vld [vmem:[#allocation6 + $0x20] sm:$0xff]  ;;  %v1218_v62 = vld [vmem:[#allocation6 + $0x28] sm:$0xff]  ;;  %v1152_v2 = vrot.slane %v2869_v63, 1 }
 0x378   :  { %1106 = vst [vmem:[#allocation2 + $0x28] sm:$0x1] %v1081_v54  ;;  %1551 = vmatpush.msra.mxu1 %v1264_v47  ;;  %1523 = vmatpush.msra.mxu0 %v1230_v0  ;;  %v1249_v55 = vld [vmem:[#allocation6 + $0x120] sm:$0xff]  ;;  %v1250_v52 = vld [vmem:[#allocation6 + $0x128] sm:$0xff]  ;;  %v1215_v42 = vld [vmem:[#allocation6 + $0x10] sm:$0xff]  ;;  %v1155_v47 = vrot.slane %v2875_v10, 1 }
 0x379   :  { %1108 = vst [vmem:[#allocation2 + $0x38] sm:$0xfe] %v1084_v17  ;;  %1465 = vmatpush.msra.mxu2 %v1229_v7  ;;  %1494 = vmatpush.msra.mxu3 %v1261_v39  ;;  %v1247_v43 = vld [vmem:[#allocation6 + $0x110] sm:$0xff]  ;;  %v1216_v4 = vld [vmem:[#allocation6 + $0x18] sm:$0xff]  ;;  %v1213_v17 = vld [vmem:[#allocation6] sm:$0xff] }
 0x37a   :  { %v1121_v50 = vld [vmem:[#allocation2] sm:$0xfe]  ;;  %1552 = vmatpush.msra.mxu1 %v1262_v1  ;;  %1112 = vst [vmem:[#allocation2 + $0x58] sm:$0x1] %v1087_v9  ;;  %1524 = vmatpush.msra.mxu0 %v1228_v36  ;;  %v1248_v5 = vld [vmem:[#allocation6 + $0x118] sm:$0xff]  ;;  %v1214_v18 = vld [vmem:[#allocation6 + $0x8] sm:$0xff] }
 0x37b   :  { %v1141_v61 = vrot.slane %v1121_v50, 1  ;;  %v1123_v38 = vld [vmem:[#allocation2 + $0x20] sm:$0x1]  ;;  %1466 = vmatpush.msra.mxu2 %v1227_v13  ;;  %1495 = vmatpush.msra.mxu3 %v1259_v11  ;;  %v1246_v31 = vld [vmem:[#allocation6 + $0x108] sm:$0xff]  ;;  %v1605_v51 = vld [vmem:[#allocation6 + $0x4f0] sm:$0xff] }
 0x37c   :  { %1553 = vmatpush.msra.mxu1 %v1260_v22  ;;  %v1147_v25 = vrot.slane %v1123_v38, 1  ;;  %1525 = vmatpush.msra.mxu0 %v1226_v16  ;;  %v1125_v53 = vld [vmem:[#allocation2 + $0x30] sm:$0xfe]  ;;  %v1245_v9 = vld [vmem:[#allocation6 + $0x100] sm:$0xff]  ;;  %v1606_v39 = vld [vmem:[#allocation6 + $0x4f8] sm:$0xff] }
 0x37d   :  { %v1143_v12 = vsel %vm99_vm0, %v1141_v61, %v1142_v20  ;;  %1467 = vmatpush.msra.mxu2 %v1225_v23  ;;  %1496 = vmatpush.msra.mxu3 %v1257_v15  ;;  %v1151_v8 = vrot.slane %v1125_v53, 1  ;;  %v1127_v6 = vld [vmem:[#allocation2 + $0x50] sm:$0x1]  ;;  %v1638_v50 = vld [vmem:[#allocation6 + $0x5f8] sm:$0xff]  ;;  %v1603_v61 = vld [vmem:[#allocation6 + $0x4e0] sm:$0xff] }
 0x37e   :  { %1358 = vmatmul.f32.vlgmr.msrb.gmra.mxu2 %v1143_v12  ;;  %1416 = vmatmul.f32.vlgmr.msrb.gmra.mxu0 %v1143_v12  ;;  %v1122_v28 = vld [vmem:[#allocation2 + $0x8] sm:$0xfe]  ;;  %v1148_v40 = vsel %vm99_vm0, %v1142_v20, %v1147_v25  ;;  %v1637_v46 = vld [vmem:[#allocation6 + $0x5f0] sm:$0xff]  ;;  %v1157_v7 = vrot.slane %v1127_v6, 1  ;;  %v1635_v20 = vld [vmem:[#allocation6 + $0x5e0] sm:$0xff] }
 0x37f   :  { %v1144_v24 = vrot.slane %v1122_v28, 1  ;;  %1554 = vmatpush.msra.mxu1 %v1258_v56  ;;  %1468 = vmatpush.msra.mxu2 %v1223_v14  ;;  %v1124_v44 = vld [vmem:[#allocation2 + $0x28] sm:$0x1]  ;;  %v1153_v3 = vsel %vm99_vm0, %v1151_v8, %v1152_v2  ;;  %v1601_v36 = vld [vmem:[#allocation6 + $0x4d0] sm:$0xff]  ;;  %v1602_v23 = vld [vmem:[#allocation6 + $0x4d8] sm:$0xff] }
 0x380   :  { %1497 = vmatpush.msra.mxu3 %v1255_v29  ;;  %1526 = vmatpush.msra.mxu0 %v1224_v34  ;;  %v1149_v60 = vrot.slane %v1124_v44, 1  ;;  %v1126_v54 = vld [vmem:[#allocation2 + $0x38] sm:$0xfe]  ;;  %v1158_v13 = vsel %vm99_vm0, %v1152_v2, %v1157_v7  ;;  %v1604_v11 = vld [vmem:[#allocation6 + $0x4e8] sm:$0xff]  ;;  %v1633_v22 = vld [vmem:[#allocation6 + $0x5d0] sm:$0xff] }
 0x381   :  { %v1146_v59 = vsel %vm99_vm0, %v1144_v24, %v1145_v21  ;;  %1555 = vmatpush.msra.mxu1 %v1256_v35  ;;  %1469 = vmatpush.msra.mxu2 %v1221_v30  ;;  %v1154_v37 = vrot.slane %v1126_v54, 1  ;;  %v1128_v1 = vld [vmem:[#allocation2 + $0x58] sm:$0x1]  ;;  %v1636_v12 = vld [vmem:[#allocation6 + $0x5e8] sm:$0xff]  ;;  %v1599_v16 = vld [vmem:[#allocation6 + $0x4c0] sm:$0xff] }
 0x382   :  { %1387 = vmatmul.f32.vlgmr.msrb.gmra.mxu3 %v1146_v59  ;;  %1445 = vmatmul.f32.vlgmr.msrb.gmra.mxu1 %v1146_v59  ;;  %v1150_v33 = vsel %vm99_vm0, %v1145_v21, %v1149_v60  ;;  %v1159_v38 = vrot.slane %v1128_v1, 1  ;;  %v1634_v15 = vld [vmem:[#allocation6 + $0x5d8] sm:$0xff]  ;;  %v1631_v56 = vld [vmem:[#allocation6 + $0x5c0] sm:$0xff]  ;;  %v1600_v28 = vld [vmem:[#allocation6 + $0x4c8] sm:$0xff] }
 0x383   :  { %1498 = vmatpush.msra.mxu3 %v1253_v58  ;;  %1527 = vmatpush.msra.mxu0 %v1222_v41  ;;  %v1156_v0 = vsel %vm99_vm0, %v1154_v37, %v1155_v47  ;;  %v1632_v14 = vld [vmem:[#allocation6 + $0x5c8] sm:$0xff]  ;;  %v1597_v24 = vld [vmem:[#allocation6 + $0x4b0] sm:$0xff]  ;;  %v1113_v25 = vld [vmem:[#allocation2] sm:$0xff] }
 0x384   :  { %1556 = vmatpush.msra.mxu1 %v1254_v48  ;;  %1470 = vmatpush.msra.mxu2 %v1219_v57  ;;  %v1160_v29 = vsel %vm99_vm0, %v1155_v47, %v1159_v38  ;;  %v1629_v21 = vld [vmem:[#allocation6 + $0x5b0] sm:$0xff]  ;;  %v1598_v34 = vld [vmem:[#allocation6 + $0x4b8] sm:$0xff]  ;;  %v1595_v59 = vld [vmem:[#allocation6 + $0x4a0] sm:$0xff] }
 0x385   :  { %1499 = vmatpush.msra.mxu3 %v1251_v49  ;;  %1528 = vmatpush.msra.mxu0 %v1220_v26  ;;  %v1630_v35 = vld [vmem:[#allocation6 + $0x5b8] sm:$0xff]  ;;  %v1627_v44 = vld [vmem:[#allocation6 + $0x5a0] sm:$0xff]  ;;  %v1596_v30 = vld [vmem:[#allocation6 + $0x4a8] sm:$0xff] }
 0x386   :  { %1361 = vmatmul.f32.gmra.mxu2 %v1148_v40  ;;  %1419 = vmatmul.f32.gmra.mxu0 %v1148_v40  ;;  %v1628_v58 = vld [vmem:[#allocation6 + $0x5a8] sm:$0xff]  ;;  %v1593_v40 = vld [vmem:[#allocation6 + $0x490] sm:$0xff]  ;;  %v1594_v48 = vld [vmem:[#allocation6 + $0x498] sm:$0xff] }
 0x387   :  { %1557 = vmatpush.msra.mxu1 %v1252_v27  ;;  %1471 = vmatpush.msra.mxu2 %v1217_v32  ;;  %v1625_v41 = vld [vmem:[#allocation6 + $0x590] sm:$0xff]  ;;  %v1626_v53 = vld [vmem:[#allocation6 + $0x598] sm:$0xff]  ;;  %v1114_v57 = vld [vmem:[#allocation2 + $0x8] sm:$0xff] }
 0x388   :  { %1500 = vmatpush.msra.mxu3 %v1249_v55  ;;  %1529 = vmatpush.msra.mxu0 %v1218_v62  ;;  %v1591_v49 = vld [vmem:[#allocation6 + $0x480] sm:$0xff]  ;;  %v1592_v26 = vld [vmem:[#allocation6 + $0x488] sm:$0xff]  ;;  %v1589_v32 = vld [vmem:[#allocation6 + $0x470] sm:$0xff] }
 0x389   :  { %1558 = vmatpush.msra.mxu1 %v1250_v52  ;;  %1472 = vmatpush.msra.mxu2 %v1215_v42  ;;  %v1623_v60 = vld [vmem:[#allocation6 + $0x580] sm:$0xff]  ;;  %v1624_v27 = vld [vmem:[#allocation6 + $0x588] sm:$0xff]  ;;  %v1621_v55 = vld [vmem:[#allocation6 + $0x570] sm:$0xff] }
 0x38a   :  { %1390 = vmatmul.f32.gmra.mxu3 %v1150_v33  ;;  %1448 = vmatmul.f32.gmra.mxu1 %v1150_v33  ;;  %v1590_v8 = vld [vmem:[#allocation6 + $0x478] sm:$0xff]  ;;  %v1587_v52 = vld [vmem:[#allocation6 + $0x460] sm:$0xff]  ;;  %v1588_v2 = vld [vmem:[#allocation6 + $0x468] sm:$0xff] }
 0x38b   :  { %1501 = vmatpush.msra.mxu3 %v1247_v43  ;;  %1530 = vmatpush.msra.mxu0 %v1216_v4  ;;  %v1622_v62 = vld [vmem:[#allocation6 + $0x578] sm:$0xff]  ;;  %v1619_v33 = vld [vmem:[#allocation6 + $0x560] sm:$0xff]  ;;  %v1620_v54 = vld [vmem:[#allocation6 + $0x568] sm:$0xff] }
 0x38c   :  { %1559 = vmatpush.msra.mxu1 %v1248_v5  ;;  %1473 = vmatpush.msra.mxu2 %v1213_v17  ;;  %v1585_v42 = vld [vmem:[#allocation6 + $0x450] sm:$0xff]  ;;  %v1586_v4 = vld [vmem:[#allocation6 + $0x458] sm:$0xff]  ;;  %v1583_v6 = vld [vmem:[#allocation6 + $0x440] sm:$0xff] }
 0x38d   :  { %1502 = vmatpush.msra.mxu3 %v1245_v9  ;;  %1531 = vmatpush.msra.mxu0 %v1214_v18  ;;  %v1617_v43 = vld [vmem:[#allocation6 + $0x550] sm:$0xff]  ;;  %v1618_v5 = vld [vmem:[#allocation6 + $0x558] sm:$0xff]  ;;  %v1615_v17 = vld [vmem:[#allocation6 + $0x540] sm:$0xff] }
 0x38e   :  { %1364 = vmatmul.f32.gmra.mxu2 %v1153_v3  ;;  %1422 = vmatmul.f32.gmra.mxu0 %v1153_v3  ;;  %v1117_v3 = vld [vmem:[#allocation2 + $0x30] sm:$0xff]  ;;  %v1584_v9 = vld [vmem:[#allocation6 + $0x448] sm:$0xff]  ;;  %v1118_v47 = vld [vmem:[#allocation2 + $0x38] sm:$0xff] }
 0x38f   :  { %1560 = vmatpush.msra.mxu1 %v1246_v31  ;;  %1639 = vmatpush.msrb.mxu2 %v1605_v51  ;;  %v1616_v37 = vld [vmem:[#allocation6 + $0x548] sm:$0xff]  ;;  %v1581_v18 = vld [vmem:[#allocation6 + $0x430] sm:$0xff]  ;;  %v1582_v51 = vld [vmem:[#allocation6 + $0x438] sm:$0xff] }
 0x390   :  { %1668 = vmatpush.msrb.mxu3 %v1637_v46  ;;  %1697 = vmatpush.msrb.mxu0 %v1606_v39  ;;  %v1613_v31 = vld [vmem:[#allocation6 + $0x530] sm:$0xff]  ;;  %v1614_v46 = vld [vmem:[#allocation6 + $0x538] sm:$0xff]  ;;  %v1579_v7 = vld [vmem:[#allocation6 + $0x420] sm:$0xff] }
 0x391   :  { %1726 = vmatpush.msrb.mxu1 %v1638_v50  ;;  %1640 = vmatpush.msrb.mxu2 %v1603_v61  ;;  %v1611_v39 = vld [vmem:[#allocation6 + $0x520] sm:$0xff]  ;;  %v1580_v50 = vld [vmem:[#allocation6 + $0x428] sm:$0xff]  ;;  %v1577_v1 = vld [vmem:[#allocation6 + $0x410] sm:$0xff] }
 0x392   :  { %1393 = vmatmul.f32.gmra.mxu3 %v1156_v0  ;;  %1451 = vmatmul.f32.gmra.mxu1 %v1156_v0  ;;  %v1612_v0 = vld [vmem:[#allocation6 + $0x528] sm:$0xff]  ;;  %v1609_v61 = vld [vmem:[#allocation6 + $0x510] sm:$0xff] }
 0x393   :  { %1669 = vmatpush.msrb.mxu3 %v1635_v20  ;;  %1698 = vmatpush.msrb.mxu0 %v1604_v11  ;;  %v1169_v20 = vld [vmem:[#allocation2] sm:$0xfc]  ;;  %v1610_v11 = vld [vmem:[#allocation6 + $0x518] sm:$0xff]  ;;  %v1576_v38 = vld [vmem:[#allocation6 + $0x408] sm:$0xff] }
 0x394   :  { %1727 = vmatpush.msrb.mxu1 %v1636_v12  ;;  %1641 = vmatpush.msrb.mxu2 %v1601_v36  ;;  %v1575_v12 = vld [vmem:[#allocation6 + $0x400] sm:$0xff] }
 0x395   :  { %1670 = vmatpush.msrb.mxu3 %v1633_v22  ;;  %1699 = vmatpush.msrb.mxu0 %v1602_v23  ;;  %v1607_v36 = vld [vmem:[#allocation6 + $0x500] sm:$0xff]  ;;  %v1185_v22 = vrot.slane %v1169_v20, 2  ;;  %v1608_v23 = vld [vmem:[#allocation6 + $0x508] sm:$0xff]  ;;  %v1812_v20 = vld [vmem:[%s3200_s9 + $0xf8] sm:$0xff] }
 0x396   :  { %1367 = vmatmul.f32.gmra.mxu2 %v1158_v13  ;;  %1425 = vmatmul.f32.gmra.mxu0 %v1158_v13  ;;  %v1578_v13 = vld [vmem:[#allocation6 + $0x418] sm:$0xff] }
 0x397   :  { %1728 = vmatpush.msrb.mxu1 %v1634_v15  ;;  %1642 = vmatpush.msrb.mxu2 %v1599_v16  ;;  %v1186_v15 = vrot.slane %v2866_v45, 2  ;;  %v1170_v16 = vld [vmem:[#allocation2 + $0x8] sm:$0xfc] }
 0x398   :  { %1671 = vmatpush.msrb.mxu3 %v1631_v56  ;;  %1700 = vmatpush.msrb.mxu0 %v1600_v28  ;;  %v1171_v28 = vld [vmem:[#allocation2 + $0x20] sm:$0x3] }
 0x399   :  { %1729 = vmatpush.msrb.mxu1 %v1632_v14  ;;  %1643 = vmatpush.msrb.mxu2 %v1597_v24  ;;  %v1187_v56 = vsel %vm144_vm1, %v1185_v22, %v1186_v15  ;;  %v1188_v14 = vrot.slane %v1170_v16, 2  ;;  %v1191_v24 = vrot.slane %v1171_v28, 2  ;;  %v1811_v22 = vld [vmem:[%s3200_s9 + $0xf0] sm:$0xff]  ;;  %v1808_v28 = vld [vmem:[%s3200_s9 + $0xd8] sm:$0xff] }
 0x39a   :  { %1396 = vmatmul.f32.gmra.mxu3 %v1160_v29  ;;  %1454 = vmatmul.f32.gmra.mxu1 %v1160_v29  ;;  %v1189_v29 = vrot.slane %v2872_v19, 2 }
 0x39b   :  { %1672 = vmatpush.msrb.mxu3 %v1629_v21  ;;  %1701 = vmatpush.msrb.mxu0 %v1598_v34  ;;  %v1173_v34 = vld [vmem:[#allocation2 + $0x30] sm:$0xfc] }
 0x39c   :  { %1730 = vmatpush.msrb.mxu1 %v1630_v35  ;;  %1644 = vmatpush.msrb.mxu2 %v1595_v59  ;;  %v1190_v21 = vsel %vm144_vm1, %v1188_v14, %v1189_v29  ;;  %v1195_v59 = vrot.slane %v1173_v34, 2  ;;  %v1794_v14 = vld [vmem:[%s3200_s9 + $0x68] sm:$0xff] }
 0x39d   :  { %1673 = vmatpush.msrb.mxu3 %v1627_v44  ;;  %1702 = vmatpush.msrb.mxu0 %v1596_v30  ;;  %v1196_v30 = vrot.slane %v2869_v63, 2 }
 0x39e   :  { %1474 = vmatmul.f32.vlgmr.msra.gmra.mxu2 %v1113_v25  ;;  %1532 = vmatmul.f32.vlgmr.msra.gmra.mxu0 %v1113_v25  ;;  %v1192_v25 = vsel %vm144_vm1, %v1186_v15, %v1191_v24  ;;  %v1809_v15 = vld [vmem:[%s3200_s9 + $0xe0] sm:$0xff] }
 0x39f   :  { %1731 = vmatpush.msrb.mxu1 %v1628_v58  ;;  %1645 = vmatpush.msrb.mxu2 %v1593_v40  ;;  %v1197_v58 = vsel %vm144_vm1, %v1195_v59, %v1196_v30  ;;  %v1175_v40 = vld [vmem:[#allocation2 + $0x50] sm:$0x3] }
 0x3a0   :  { %1674 = vmatpush.msrb.mxu3 %v1625_v41  ;;  %1703 = vmatpush.msrb.mxu0 %v1594_v48  ;;  %v1199_v48 = vrot.slane %v2875_v10, 2 }
 0x3a1   :  { %1732 = vmatpush.msrb.mxu1 %v1626_v53  ;;  %1646 = vmatpush.msrb.mxu2 %v1591_v49  ;;  %v1201_v53 = vrot.slane %v1175_v40, 2  ;;  %v1176_v49 = vld [vmem:[#allocation2 + $0x58] sm:$0x3]  ;;  %v1806_v40 = vld [vmem:[%s3200_s9 + $0xc8] sm:$0xff] }
 0x3a2   :  { %1503 = vmatmul.f32.vlgmr.msra.gmra.mxu3 %v1114_v57  ;;  %1561 = vmatmul.f32.vlgmr.msra.gmra.mxu1 %v1114_v57 }
 0x3a3   :  { %1675 = vmatpush.msrb.mxu3 %v1623_v60  ;;  %1704 = vmatpush.msrb.mxu0 %v1592_v26  ;;  %v1202_v60 = vsel %vm144_vm1, %v1196_v30, %v1201_v53  ;;  %v1791_v53 = vld [vmem:[%s3200_s9 + $0x50] sm:$0xff] }
 0x3a4   :  { %1733 = vmatpush.msrb.mxu1 %v1624_v27  ;;  %1647 = vmatpush.msrb.mxu2 %v1589_v32 }
 0x3a5   :  { %1676 = vmatpush.msrb.mxu3 %v1621_v55  ;;  %1705 = vmatpush.msrb.mxu0 %v1590_v8 }
 0x3a6   :  { %1477 = vmatmul.f32.gmra.mxu2 %v2866_v45  ;;  %1535 = vmatmul.f32.gmra.mxu0 %v2866_v45  ;;  %v1172_v45 = vld [vmem:[#allocation2 + $0x28] sm:$0x3] }
 0x3a7   :  { %1734 = vmatpush.msrb.mxu1 %v1622_v62  ;;  %1648 = vmatpush.msrb.mxu2 %v1587_v52  ;;  %v1193_v35 = vrot.slane %v1172_v45, 2  ;;  %v1807_v45 = vld [vmem:[%s3200_s9 + $0xd0] sm:$0xff] }
 0x3a8   :  { %1677 = vmatpush.msrb.mxu3 %v1619_v33  ;;  %1706 = vmatpush.msrb.mxu0 %v1588_v2 }
 0x3a9   :  { %1735 = vmatpush.msrb.mxu1 %v1620_v54  ;;  %1649 = vmatpush.msrb.mxu2 %v1585_v42  ;;  %v1194_v44 = vsel %vm144_vm1, %v1189_v29, %v1193_v35 }
 0x3aa   :  { %1506 = vmatmul.f32.gmra.mxu3 %v2872_v19  ;;  %1564 = vmatmul.f32.gmra.mxu1 %v2872_v19  ;;  %v1174_v19 = vld [vmem:[#allocation2 + $0x38] sm:$0xfc] }
 0x3ab   :  { %1678 = vmatpush.msrb.mxu3 %v1617_v43  ;;  %1707 = vmatpush.msrb.mxu0 %v1586_v4  ;;  %v1198_v41 = vrot.slane %v1174_v19, 2 }
 0x3ac   :  { %1736 = vmatpush.msrb.mxu1 %v1618_v5  ;;  %1650 = vmatpush.msrb.mxu2 %v1583_v6 }
 0x3ad   :  { %1679 = vmatpush.msrb.mxu3 %v1615_v17  ;;  %1708 = vmatpush.msrb.mxu0 %v1584_v9  ;;  %v1200_v57 = vsel %vm144_vm1, %v1198_v41, %v1199_v48  ;;  %v1792_v41 = vld [vmem:[%s3200_s9 + $0x58] sm:$0xff] }
 0x3ae   :  { %1480 = vmatmul.f32.gmra.mxu2 %v1117_v3  ;;  %1538 = vmatmul.f32.gmra.mxu0 %v1117_v3 }
 0x3af   :  { %1737 = vmatpush.msrb.mxu1 %v1616_v37  ;;  %1651 = vmatpush.msrb.mxu2 %v1581_v18 }
 0x3b0   :  { %1680 = vmatpush.msrb.mxu3 %v1613_v31  ;;  %1709 = vmatpush.msrb.mxu0 %v1582_v51 }
 0x3b1   :  { %1738 = vmatpush.msrb.mxu1 %v1614_v46  ;;  %1652 = vmatpush.msrb.mxu2 %v1579_v7 }
 0x3b2   :  { %1509 = vmatmul.f32.gmra.mxu3 %v1118_v47  ;;  %1567 = vmatmul.f32.gmra.mxu1 %v1118_v47 }
 0x3b3   :  { %1681 = vmatpush.msrb.mxu3 %v1611_v39  ;;  %1710 = vmatpush.msrb.mxu0 %v1580_v50 }
 0x3b4   :  { %1739 = vmatpush.msrb.mxu1 %v1612_v0  ;;  %1653 = vmatpush.msrb.mxu2 %v1577_v1 }
 0x3b5   :  { %1682 = vmatpush.msrb.mxu3 %v1609_v61  ;;  %1711 = vmatpush.msrb.mxu0 %v1578_v13 }
 0x3b6   :  { %1483 = vmatmul.f32.gmra.mxu2 %v2869_v63  ;;  %1541 = vmatmul.f32.gmra.mxu0 %v2869_v63  ;;  %v1203_v63 = vrot.slane %v1176_v49, 2  ;;  %v1790_v49 = vld [vmem:[%s3200_s9 + $0x48] sm:$0xff] }
 0x3b7   :  { %1740 = vmatpush.msrb.mxu1 %v1610_v11  ;;  %1654 = vmatpush.msrb.mxu2 %v1575_v12 }
 0x3b8   :  { %1683 = vmatpush.msrb.mxu3 %v1607_v36  ;;  %1712 = vmatpush.msrb.mxu0 %v1576_v38  ;;  %v1204_v26 = vsel %vm144_vm1, %v1199_v48, %v1203_v63  ;;  %v1810_v38 = vld [vmem:[%s3200_s9 + $0xe8] sm:$0xff]  ;;  %v1805_v48 = vld [vmem:[%s3200_s9 + $0xc0] sm:$0xff] }
 0x3b9   :  { %1741 = vmatpush.msrb.mxu1 %v1608_v23  ;;  %v1796_v23 = vld [vmem:[%s3200_s9 + $0x78] sm:$0xff] }
 0x3ba   :  { %1512 = vmatmul.f32.gmra.mxu3 %v2875_v10  ;;  %1570 = vmatmul.f32.gmra.mxu1 %v2875_v10 }
 0x3bb   :  { %1833 = vmatpush.msra.mxu3 %v1812_v20  ;;  %1957 = vmatpush.msra.mxu1 %v1812_v20 }
 0x3bc   :  { %1813 = vmatpush.msra.mxu2 %v1796_v23  ;;  %1937 = vmatpush.msra.mxu0 %v1796_v23 }
 0x3bd   :  { %1834 = vmatpush.msra.mxu3 %v1811_v22  ;;  %1958 = vmatpush.msra.mxu1 %v1811_v22  ;;  %v1799_v22 = vld [vmem:[%s3200_s9 + $0x90] sm:$0xff] }
 0x3be   :  { %1655 = vmatmul.f32.vlgmr.msrb.gmra.mxu2 %v1187_v56  ;;  %1713 = vmatmul.f32.vlgmr.msrb.gmra.mxu0 %v1187_v56  ;;  %v1795_v56 = vld [vmem:[%s3200_s9 + $0x70] sm:$0xff] }
 0x3bf   :  { %1835 = vmatpush.msra.mxu3 %v1810_v38  ;;  %1959 = vmatpush.msra.mxu1 %v1810_v38  ;;  %v1785_v38 = vld [vmem:[%s3200_s9 + $0x20] sm:$0xff] }
 0x3c0   :  { %1814 = vmatpush.msra.mxu2 %v1795_v56  ;;  %1938 = vmatpush.msra.mxu0 %v1795_v56 }
 0x3c1   :  { %1836 = vmatpush.msra.mxu3 %v1809_v15  ;;  %1960 = vmatpush.msra.mxu1 %v1809_v15 }
 0x3c2   :  { %1684 = vmatmul.f32.vlgmr.msrb.gmra.mxu3 %v1190_v21  ;;  %1742 = vmatmul.f32.vlgmr.msrb.gmra.mxu1 %v1190_v21 }
 0x3c3   :  { %1837 = vmatpush.msra.mxu3 %v1808_v28  ;;  %1815 = vmatpush.msra.mxu2 %v1794_v14 }
 0x3c4   :  { %1939 = vmatpush.msra.mxu0 %v1794_v14  ;;  %1961 = vmatpush.msra.mxu1 %v1808_v28 }
 0x3c5   :  { %1838 = vmatpush.msra.mxu3 %v1807_v45 }
 0x3c6   :  { %1658 = vmatmul.f32.gmra.mxu2 %v1192_v25  ;;  %1716 = vmatmul.f32.gmra.mxu0 %v1192_v25  ;;  %v1793_v25 = vld [vmem:[%s3200_s9 + $0x60] sm:$0xff] }
 0x3c7   :  { %1816 = vmatpush.msra.mxu2 %v1793_v25  ;;  %1940 = vmatpush.msra.mxu0 %v1793_v25 }
 0x3c8   :  { %1962 = vmatpush.msra.mxu1 %v1807_v45  ;;  %1839 = vmatpush.msra.mxu3 %v1806_v40  ;;  %v1797_v45 = vld [vmem:[%s3200_s9 + $0x80] sm:$0xff] }
 0x3c9   :  { %1817 = vmatpush.msra.mxu2 %v1792_v41  ;;  %1941 = vmatpush.msra.mxu0 %v1792_v41 }
 0x3ca   :  { %1687 = vmatmul.f32.gmra.mxu3 %v1194_v44  ;;  %1745 = vmatmul.f32.gmra.mxu1 %v1194_v44 }
 0x3cb   :  { %1963 = vmatpush.msra.mxu1 %v1806_v40  ;;  %1840 = vmatpush.msra.mxu3 %v1805_v48  ;;  %v1781_v40 = vld [vmem:[%s3200_s9] sm:$0xff] }
 0x3cc   :  { %1818 = vmatpush.msra.mxu2 %v1791_v53  ;;  %1942 = vmatpush.msra.mxu0 %v1791_v53 }
 0x3cd   :  { %1964 = vmatpush.msra.mxu1 %v1805_v48 }
 0x3ce   :  { %1661 = vmatmul.f32.gmra.mxu2 %v1197_v58  ;;  %1719 = vmatmul.f32.gmra.mxu0 %v1197_v58 }
 0x3cf   :  { %1819 = vmatpush.msra.mxu2 %v1790_v49  ;;  %1943 = vmatpush.msra.mxu0 %v1790_v49 }
 0x3d2   :  { %1690 = vmatmul.f32.gmra.mxu3 %v1200_v57  ;;  %1748 = vmatmul.f32.gmra.mxu1 %v1200_v57  ;;  %v1804_v57 = vld [vmem:[%s3200_s9 + $0xb8] sm:$0xff] }
 0x3d3   :  { %1841 = vmatpush.msra.mxu3 %v1804_v57  ;;  %1965 = vmatpush.msra.mxu1 %v1804_v57 }
 0x3d6   :  { %1664 = vmatmul.f32.gmra.mxu2 %v1202_v60  ;;  %1722 = vmatmul.f32.gmra.mxu0 %v1202_v60 }
 0x3da   :  { %1693 = vmatmul.f32.gmra.mxu3 %v1204_v26  ;;  %1751 = vmatmul.f32.gmra.mxu1 %v1204_v26 }
 0x3fb   :  { %v1417_v27 = vpop.f32.mrf.mxu0 }
 0x3ff   :  { %v1446_v32 = vpop.f32.mrf.mxu1 }
 0x400   :  { %v2909_v8 = vadd.f32 %v1446_v32, %v1417_v27  ;;  %v1803_v27 = vld [vmem:[%s3200_s9 + $0xb0] sm:$0xff]  ;;  %v1789_v32 = vld [vmem:[%s3200_s9 + $0x40] sm:$0xff] }
 0x401   :  { %v1359_v55 = vpop.f32.mrf.mxu2  ;;  %1842 = vmatpush.msra.mxu3 %v1803_v27  ;;  %1820 = vmatpush.msra.mxu2 %v1789_v32 }
 0x402   :  { %1944 = vmatpush.msra.mxu0 %v1789_v32  ;;  %1966 = vmatpush.msra.mxu1 %v1803_v27 }
 0x403   :  { %v1420_v10 = vpop.f32.mrf.mxu0 }
 0x405   :  { %v1388_v62 = vpop.f32.mrf.mxu3 }
 0x406   :  { %v2911_v52 = vadd.f32 %v1388_v62, %v1359_v55  ;;  %v1802_v55 = vld [vmem:[%s3200_s9 + $0xa8] sm:$0xff]  ;;  %v1788_v62 = vld [vmem:[%s3200_s9 + $0x38] sm:$0xff] }
 0x407   :  { %v1449_v33 = vpop.f32.mrf.mxu1  ;;  %1843 = vmatpush.msra.mxu3 %v1802_v55  ;;  %1821 = vmatpush.msra.mxu2 %v1788_v62 }
 0x408   :  { %v2913_v54 = vadd.f32 %v1449_v33, %v1420_v10  ;;  %1945 = vmatpush.msra.mxu0 %v1788_v62  ;;  %1967 = vmatpush.msra.mxu1 %v1802_v55 }
 0x409   :  { %v1362_v2 = vpop.f32.mrf.mxu2 }
 0x40b   :  { %v1423_v42 = vpop.f32.mrf.mxu0 }
 0x40d   :  { %v1391_v43 = vpop.f32.mrf.mxu3 }
 0x40e   :  { %v2915_v3 = vadd.f32 %v1391_v43, %v1362_v2  ;;  %v1787_v43 = vld [vmem:[%s3200_s9 + $0x30] sm:$0xff] }
 0x40f   :  { %v1452_v4 = vpop.f32.mrf.mxu1  ;;  %1822 = vmatpush.msra.mxu2 %v1787_v43  ;;  %1946 = vmatpush.msra.mxu0 %v1787_v43 }
 0x410   :  { %v2917_v6 = vadd.f32 %v1452_v4, %v1423_v42  ;;  %v1801_v42 = vld [vmem:[%s3200_s9 + $0xa0] sm:$0xff] }
 0x411   :  { %v1365_v5 = vpop.f32.mrf.mxu2  ;;  %1844 = vmatpush.msra.mxu3 %v1801_v42  ;;  %1968 = vmatpush.msra.mxu1 %v1801_v42 }
 0x413   :  { %v2919_v17 = vpop.f32.mrf.mxu0 }
 0x415   :  { %v1394_v9 = vpop.f32.mrf.mxu3 }
 0x416   :  { %v2921_v37 = vadd.f32 %v1394_v9, %v1365_v5 }
 0x417   :  { %v2923_v18 = vpop.f32.mrf.mxu1 }
 0x418   :  { %v1456_v4 = vadd.f32 %v2923_v18, %v2919_v17 }
 0x419   :  { %v2925_v31 = vpop.f32.mrf.mxu2 }
 0x41b   :  { %v2927_v51 = vpop.f32.mrf.mxu0 }
 0x41c   :  { %v1534_v33 = vadd.f32 %v2927_v51, %v2909_v8  ;;  %v1800_v51 = vld [vmem:[%s3200_s9 + $0x98] sm:$0xff] }
 0x41d   :  { %v2929_v46 = vpop.f32.mrf.mxu3  ;;  %1845 = vmatpush.msra.mxu3 %v1800_v51  ;;  %1969 = vmatpush.msra.mxu1 %v1800_v51 }
 0x41f   :  { %v2931_v47 = vpop.f32.mrf.mxu1  ;;  %1846 = vmatpush.msra.mxu3 %v1799_v22  ;;  %1970 = vmatpush.msra.mxu1 %v1799_v22 }
 0x421   :  { %v2933_v7 = vpop.f32.mrf.mxu2 }
 0x423   :  { %v2935_v39 = vpop.f32.mrf.mxu0 }
 0x424   :  { %v1537_v26 = vadd.f32 %v2935_v39, %v2913_v54  ;;  %v1786_v39 = vld [vmem:[%s3200_s9 + $0x28] sm:$0xff] }
 0x425   :  { %v2937_v50 = vpop.f32.mrf.mxu3  ;;  %1823 = vmatpush.msra.mxu2 %v1786_v39  ;;  %1947 = vmatpush.msra.mxu0 %v1786_v39 }
 0x427   :  { %v2939_v0 = vpop.f32.mrf.mxu1  ;;  %1824 = vmatpush.msra.mxu2 %v1785_v38  ;;  %1948 = vmatpush.msra.mxu0 %v1785_v38 }
 0x428   :  { %v1566_v8 = vadd.f32 %v2939_v0, %v1537_v26  ;;  %v1563_v0 = vadd.f32 %v2931_v47, %v1534_v33  ;;  %v1476_v47 = vadd.f32 %v2933_v7, %v2911_v52  ;;  %v1784_v52 = vld [vmem:[%s3200_s9 + $0x18] sm:$0xff] }
 0x429   :  { %v2941_v1 = vpop.f32.mrf.mxu2  ;;  %1825 = vmatpush.msra.mxu2 %v1784_v52  ;;  %1949 = vmatpush.msra.mxu0 %v1784_v52 }
 0x42a   :  { %v1479_v17 = vadd.f32 %v2941_v1, %v2915_v3  ;;  %v1398_v3 = vadd.f32 %v2929_v46, %v2925_v31  ;;  %v1798_v31 = vld [vmem:[%s3200_s9 + $0x88] sm:$0xff] }
 0x42b   :  { %v2943_v61 = vpop.f32.mrf.mxu0  ;;  %1847 = vmatpush.msra.mxu3 %v1798_v31  ;;  %1971 = vmatpush.msra.mxu1 %v1798_v31 }
 0x42c   :  { %v1540_v2 = vadd.f32 %v2943_v61, %v2917_v6 }
 0x42d   :  { %v2948_v13 = vpop.f32.mrf.mxu3  ;;  %1848 = vmatpush.msra.mxu3 %v1797_v45  ;;  %1972 = vmatpush.msra.mxu1 %v1797_v45 }
 0x42f   :  { %v2950_v11 = vpop.f32.mrf.mxu1 }
 0x430   :  { %v1569_v61 = vadd.f32 %v2950_v11, %v1540_v2 }
 0x431   :  { %v2952_v12 = vpop.f32.mrf.mxu2 }
 0x432   :  { %v1482_v1 = vadd.f32 %v2952_v12, %v2921_v37  ;;  %v1508_v37 = vadd.f32 %v2948_v13, %v1479_v17  ;;  %v1783_v13 = vld [vmem:[%s3200_s9 + $0x10] sm:$0xff] }
 0x433   :  { %v2954_v36 = vpop.f32.mrf.mxu0  ;;  %1826 = vmatpush.msra.mxu2 %v1783_v13  ;;  %1950 = vmatpush.msra.mxu0 %v1783_v13 }
 0x434   :  { %v1543_v18 = vadd.f32 %v2954_v36, %v1456_v4  ;;  %v1856_v4 = vld [vmem:[%s3201_s10 + $0x10] sm:$0xff] }
 0x435   :  { %v2968_v16 = vpop.f32.mrf.mxu3 }
 0x436   :  { %v1511_v25 = vadd.f32 %v2968_v16, %v1482_v1 }
 0x437   :  { %v2979_v29 = vpop.f32.mrf.mxu1 }
 0x438   :  { %v1572_v46 = vadd.f32 %v2979_v29, %v1543_v18  ;;  %v1505_v29 = vadd.f32 %v2937_v50, %v1476_v47 }
 0x439   :  { %v2981_v24 = vpop.f32.mrf.mxu2 }
 0x43b   :  { %v1714_v21 = vpop.f32.mrf.mxu0 }
 0x43d   :  { %v2989_v34 = vpop.f32.mrf.mxu3 }
 0x43f   :  { %v1743_v35 = vpop.f32.mrf.mxu1 }
 0x440   :  { %v1744_v6 = vadd.f32 %v1743_v35, %v1714_v21  ;;  %v1485_v35 = vadd.f32 %v2981_v24, %v1398_v3 }
 0x441   :  { %v2991_v59 = vpop.f32.mrf.mxu2 }
 0x442   :  { %v3067_v23 = vadd.f32 %v1744_v6, %v1563_v0  ;;  %v1514_v48 = vadd.f32 %v2989_v34, %v1485_v35  ;;  %v1855_v6 = vld [vmem:[%s3201_s10 + $0x8] sm:$0xff] }
 0x443   :  { %v1717_v44 = vpop.f32.mrf.mxu0 }
 0x445   :  { %v2993_v30 = vpop.f32.mrf.mxu3 }
 0x446   :  { %v1686_v7 = vadd.f32 %v2993_v30, %v2991_v59 }
 0x447   :  { %v1746_v19 = vpop.f32.mrf.mxu1 }
 0x448   :  { %v1747_v54 = vadd.f32 %v1746_v19, %v1717_v44  ;;  %v1782_v19 = vld [vmem:[%s3200_s9 + $0x8] sm:$0xff]  ;;  %v1755_v50 = vadd.f32 %v1686_v7, %v1505_v29 }
 0x449   :  { %v2995_v58 = vpop.f32.mrf.mxu2  ;;  %1827 = vmatpush.msra.mxu2 %v1782_v19  ;;  %1951 = vmatpush.msra.mxu0 %v1782_v19 }
 0x44a   :  { %v3053_v20 = vadd.f32 %v1747_v54, %v1566_v8  ;;  %v1854_v8 = vld [vmem:[%s3201_s10] sm:$0xff] }
 0x44b   :  { %v1720_v60 = vpop.f32.mrf.mxu0  ;;  %1828 = vmatpush.msra.mxu2 %v1781_v40  ;;  %1952 = vmatpush.msra.mxu0 %v1781_v40 }
 0x44c   :  { %v1772_v28 = vadd.f32 %v3053_v20, %v3067_v23 }
 0x44d   :  { %v1688_v63 = vpop.f32.mrf.mxu3  ;;  %1875 = vmatpush.msrb.mxu2 %v1856_v4 }
 0x44e   :  { %v1689_v15 = vadd.f32 %v1688_v63, %v2995_v58 }
 0x44f   :  { %v1749_v10 = vpop.f32.mrf.mxu1  ;;  %1876 = vmatpush.msrb.mxu2 %v1854_v8 }
 0x450   :  { %v1750_v9 = vadd.f32 %v1749_v10, %v1720_v60  ;;  %v3093_v59 = vadd.f32 %v1689_v15, %v1508_v37 }
 0x451   :  { %v1662_v5 = vpop.f32.mrf.mxu2 }
 0x452   :  { %v3070_v56 = vadd.f32 %v1750_v9, %v1569_v61  ;;  %v1763_v53 = vadd.f32 %v3093_v59, %v1755_v50 }
 0x453   :  { %v1723_v36 = vpop.f32.mrf.mxu0 }
 0x454   :  { %v1773_v44 = vadd.f32 %v1772_v28, %v3070_v56 }
 0x455   :  { %v1691_v11 = vpop.f32.mrf.mxu3 }
 0x456   :  { %v1692_v14 = vadd.f32 %v1691_v11, %v1662_v5  ;;  %v1857_v5 = vld [vmem:[%s3201_s10 + $0x18] sm:$0xff] }
 0x457   :  { %v1752_v12 = vpop.f32.mrf.mxu1  ;;  %1895 = vmatpush.msrb.mxu3 %v1857_v5 }
 0x458   :  { %v1753_v21 = vadd.f32 %v1752_v12, %v1723_v36  ;;  %v1759_v16 = vadd.f32 %v1692_v14, %v1511_v25 }
 0x459   :  { %v1665_v58 = vpop.f32.mrf.mxu2  ;;  %1896 = vmatpush.msrb.mxu3 %v1855_v6 }
 0x45a   :  { %v3096_v30 = vadd.f32 %v1753_v21, %v1572_v46  ;;  %v1764_v60 = vadd.f32 %v1763_v53, %v1759_v16 }
 0x45c   :  { %v1774_v24 = vadd.f32 %v1773_v44, %v3096_v30 }
 0x45d   :  { %v1694_v41 = vpop.f32.mrf.mxu3 }
 0x45e   :  { %v1775_v57 = vrot.slane %v1774_v24, 4  ;;  %v1695_v49 = vadd.f32 %v1694_v41, %v1665_v58 }
 0x460   :  { %v1776_v63 = vadd.f32 %v1775_v57, %v1774_v24  ;;  %v1761_v26 = vadd.f32 %v1695_v49, %v1514_v48 }
 0x462   :  { %v1777_v27 = vrot.slane %v1776_v63, 2  ;;  %v1765_v32 = vadd.f32 %v1764_v60, %v1761_v26 }
 0x464   :  { %v1778_v55 = vadd.f32 %v1777_v27, %v1776_v63  ;;  %v1766_v10 = vrot.slane %v1765_v32, 4 }
 0x466   :  { %v1779_v62 = vrot.slane %v1778_v55, 1  ;;  %v1767_v33 = vadd.f32 %v1766_v10, %v1765_v32 }
 0x468   :  { %v1780_v2 = vadd.f32 %v1779_v62, %v1778_v55  ;;  %v1768_v54 = vrot.slane %v1767_v33, 2 }
 0x46a   :  { %v1769_v42 = vadd.f32 %v1768_v54, %v1767_v33  ;;  %1849 = vmatmul.f32.vlgmr.msra.gmra.mxu3 %v1780_v2  ;;  %v2042_v33 = vld [vmem:[%s3197_s6] sm:$0x3]  ;;  %s2229_s6 = smov [#allocation8]  }
 0x46b   :  { %2026 = vmatpush.msra.mxu3 %v1857_v5  ;;  %v2056_v2 = vld [vmem:[%s3198_s7] sm:$0x3]  ;;  %s2112_s7 = sshll.u32 %s2229_s6, 4  ;;  %s2113_s7 = int_to_ptr.vmem [resolvable:$true] %s2112_s7 }
 0x46c   :  { %v1770_v34 = vrot.slane %v1769_v42, 1  ;;  %v2070_v54 = vld [vmem:[%s3199_s8] sm:$0x3]  ;;  %v2058_v5 = vperm.slane %v2056_v2, 0 }
 0x46d   :  { %2027 = vmatpush.msra.mxu3 %v1855_v6  ;;  %v2072_v6 = vperm.slane %v2070_v54, 0 }
 0x46e   :  { %v1771_v43 = vadd.f32 %v1770_v34, %v1769_v42 }
 0x470   :  { %1829 = vmatmul.f32.vlgmr.msra.gmra.mxu2 %v1771_v43 }
 0x471   :  { %2006 = vmatpush.msra.mxu2 %v1856_v4  ;;  %v2044_v4 = vperm.slane %v2042_v33, 0 }
 0x473   :  { %2007 = vmatpush.msra.mxu2 %v1854_v8 }
 0x4ed   :  { %v1850_v9 = vpop.f32.mrf.mxu3 }
 0x4f3   :  { %v1830_v51 = vpop.f32.mrf.mxu2 }
 0x4f4   :  { %v1851_v39 = vadd.f32 %v1850_v9, %v1830_v51  ;;  %v2045_v9 = vperm.slane %v2042_v33, 1  ;;  %v2059_v51 = vperm.slane %v2056_v2, 1 }
 0x4f6   :  { %v1853_v17 = vmul.f32 0.001953125, %v1851_v39  ;;  %v2073_v39 = vperm.slane %v2070_v54, 1 }
 0x4f8   :  { %2132 = vmatmul.msk.f32.vlgmr.msrb.gmra.mxu2 %vm818_vm2, %v1853_v17  ;;  %2133 = vmatmul.msk.f32.vlgmr.msrb.gmra.mxu3 %vm818_vm2, %v1853_v17 }
 0x57b   :  { %v1878_v18 = vpop.f32.mrf.mxu2  ;;  %v1898_v0 = vpop.f32.mrf.mxu3 }
 0x57c   :  { %v1901_v61 = vperm.slane %v1878_v18, 0  ;;  %v1902_v22 = vperm.slane %v1898_v0, 0 }
 0x57e   :  { %v3121_v38 = vsub.f32 %v1755_v50, %v1901_v61  ;;  %v3124_v3 = vsub.f32 %v3093_v59, %v1901_v61  ;;  %v3126_v47 = vsub.f32 %v1759_v16, %v1901_v61  ;;  %v3129_v1 = vsub.f32 %v3067_v23, %v1902_v22 }
 0x57f   :  { %v3132_v11 = vsub.f32 %v3053_v20, %v1902_v22  ;;  %v3135_v36 = vsub.f32 %v3070_v56, %v1902_v22  ;;  %v3137_v15 = vsub.f32 %v1761_v26, %v1901_v61  ;;  %v3144_v37 = vsub.f32 %v3096_v30, %v1902_v22 }
 0x580   :  { %v1911_v31 = vmul.f32 %v3121_v38, %v3121_v38  ;;  %v1913_v52 = vmul.f32 %v3124_v3, %v3124_v3  ;;  %v1912_v23 = vmul.f32 %v3129_v1, %v3129_v1  ;;  %v1915_v56 = vmul.f32 %v3126_v47, %v3126_v47 }
 0x581   :  { %v1914_v20 = vmul.f32 %v3132_v11, %v3132_v11  ;;  %v1916_v7 = vmul.f32 %v3135_v36, %v3135_v36  ;;  %v1917_v28 = vmul.f32 %v3137_v15, %v3137_v15  ;;  %v1918_v21 = vmul.f32 %v3144_v37, %v3144_v37 }
 0x582   :  { %v1919_v46 = vadd.f32 %v1913_v52, %v1911_v31 }
 0x583   :  { %v1928_v12 = vadd.f32 %v1914_v20, %v1912_v23 }
 0x584   :  { %v1920_v14 = vadd.f32 %v1919_v46, %v1915_v56 }
 0x585   :  { %v1929_v45 = vadd.f32 %v1928_v12, %v1916_v7 }
 0x586   :  { %v1921_v13 = vadd.f32 %v1920_v14, %v1917_v28 }
 0x587   :  { %v1930_v29 = vadd.f32 %v1929_v45, %v1918_v21 }
 0x588   :  { %v1922_v25 = vrot.slane %v1921_v13, 4 }
 0x589   :  { %v1931_v35 = vrot.slane %v1930_v29, 4 }
 0x58a   :  { %v1923_v59 = vadd.f32 %v1922_v25, %v1921_v13 }
 0x58b   :  { %v1932_v44 = vadd.f32 %v1931_v35, %v1930_v29 }
 0x58c   :  { %v1924_v30 = vrot.slane %v1923_v59, 2 }
 0x58d   :  { %v1933_v19 = vrot.slane %v1932_v44, 2 }
 0x58e   :  { %v1925_v58 = vadd.f32 %v1924_v30, %v1923_v59 }
 0x58f   :  { %v1934_v50 = vadd.f32 %v1933_v19, %v1932_v44  ;;  %v3257_v19 = vld [vmem:[#allocation12_spill] sm:$0xff] }
 0x590   :  { %v1926_v16 = vrot.slane %v1925_v58, 1 }
 0x591   :  { %v1935_v24 = vrot.slane %v1934_v50, 1 }
 0x592   :  { %v1927_v40 = vadd.f32 %v1926_v16, %v1925_v58 }
 0x593   :  { %v1936_v41 = vadd.f32 %v1935_v24, %v1934_v50  ;;  %v3258_v50 = vld [vmem:[#allocation14_spill] sm:$0xff]  ;;  %v3259_v24 = vld [vmem:[#allocation16_spill] sm:$0xff] }
 0x594   :  { %1953 = vmatmul.f32.vlgmr.msra.gmra.mxu0 %v1927_v40 }
 0x595   :  { %1973 = vmatmul.f32.vlgmr.msra.gmra.mxu1 %v1936_v41  ;;  %v3260_v41 = vld [vmem:[#allocation18_spill] sm:$0xff] }
 0x611   :  { %v1954_v48 = vpop.f32.mrf.mxu0 }
 0x612   :  { %v1974_v53 = vpop.f32.mrf.mxu1 }
 0x613   :  { %v1975_v57 = vadd.f32 %v1974_v53, %v1954_v48  ;;  %v3261_v53 = vld [vmem:[#allocation13_spill] sm:$0xff] }
 0x615   :  { %v1977_v49 = vmul.f32 0.001953125, %v1975_v57 }
 0x617   :  { %v1978_v60 = vadd.f32 1e-05, %v1977_v49  ;;  %v3262_v49 = vld [vmem:[#allocation15_spill] sm:$0xff] }
 0x619   :  { %2144 = vrsqrt.f32 %v1978_v60  ;;  %vm1985_vm9 = vweird.f32 %v1978_v60 }
 0x61f   :  { %v2145_v63 = vpop.eup %2144 }
 0x620   :  { %v1980_v26 = vmul.f32 %v2145_v63, %v1978_v60  ;;  %vm1986_vm8 = vweird.f32 %v2145_v63 }
 0x621   :  { %vm1987_vm10 = vmor %vm1985_vm9, %vm1986_vm8 }
 0x622   :  { %v1981_v27 = vmul.f32 %v2145_v63, %v1980_v26 }
 0x624   :  { %v1982_v32 = vmul.f32 0.5, %v1981_v27 }
 0x626   :  { %v1983_v55 = vsub.f32 1.5, %v1982_v32  ;;  %v3263_v32 = vld [vmem:[#allocation17_spill] sm:$0xff] }
 0x628   :  { %v1984_v10 = vmul.f32 %v2145_v63, %v1983_v55 }
 0x62a   :  { %v1988_v62 = vsel %vm1987_vm10, %v2145_v63, %v1984_v10 }
 0x62b   :  { %2134 = vmatmul.msk.f32.vlgmr.msra.gmra.mxu2 %vm818_vm2, %v1988_v62  ;;  %2135 = vmatmul.msk.f32.vlgmr.msra.gmra.mxu3 %vm818_vm2, %v1988_v62  ;;  %v3264_v62 = vld [vmem:[#allocation19_spill] sm:$0xff] }
 0x6ae   :  { %v2009_v42 = vpop.f32.mrf.mxu2  ;;  %v2029_v34 = vpop.f32.mrf.mxu3 }
 0x6af   :  { %v2032_v43 = vperm.slane %v2009_v42, 0  ;;  %v2033_v8 = vperm.slane %v2029_v34, 0 }
 0x6b1   :  { %v2034_v17 = vmul.f32 %v2032_v43, %v3121_v38  ;;  %v2036_v18 = vmul.f32 %v2032_v43, %v3124_v3  ;;  %v2038_v0 = vmul.f32 %v2032_v43, %v3126_v47  ;;  %v2040_v61 = vmul.f32 %v2032_v43, %v3137_v15 }
 0x6b2   :  { %v2035_v22 = vmul.f32 %v2033_v8, %v3129_v1  ;;  %v2037_v31 = vmul.f32 %v2033_v8, %v3132_v11  ;;  %v2039_v52 = vmul.f32 %v2033_v8, %v3135_v36  ;;  %v2041_v23 = vmul.f32 %v2033_v8, %v3144_v37 }
 0x6b3   :  { %v2048_v20 = vmul.f32 %v2044_v4, %v2034_v17  ;;  %v2050_v56 = vmul.f32 %v2044_v4, %v2036_v18  ;;  %v2052_v46 = vmul.f32 %v2044_v4, %v2038_v0  ;;  %v2054_v7 = vmul.f32 %v2044_v4, %v2040_v61 }
 0x6b4   :  { %v2049_v12 = vmul.f32 %v2045_v9, %v2035_v22  ;;  %v2051_v38 = vmul.f32 %v2045_v9, %v2037_v31  ;;  %v2053_v28 = vmul.f32 %v2045_v9, %v2039_v52  ;;  %v2055_v3 = vmul.f32 %v2045_v9, %v2041_v23 }
 0x6b5   :  { %v2062_v14 = vadd.f32 %v2058_v5, %v2048_v20  ;;  %v2064_v47 = vadd.f32 %v2058_v5, %v2050_v56  ;;  %v2066_v21 = vadd.f32 %v2058_v5, %v2052_v46  ;;  %v2068_v15 = vadd.f32 %v2058_v5, %v2054_v7 }
 0x6b6   :  { %v2063_v45 = vadd.f32 %v2059_v51, %v2049_v12  ;;  %v2065_v1 = vadd.f32 %v2059_v51, %v2051_v38  ;;  %v2067_v13 = vadd.f32 %v2059_v51, %v2053_v28  ;;  %v2069_v11 = vadd.f32 %v2059_v51, %v2055_v3 }
 0x6b7   :  { %v2076_v29 = vadd.f32 %v2072_v6, %v2062_v14  ;;  %v2078_v36 = vadd.f32 %v2072_v6, %v2064_v47  ;;  %v2080_v25 = vadd.f32 %v2072_v6, %v2066_v21  ;;  %v2082_v37 = vadd.f32 %v2072_v6, %v2068_v15 }
 0x6b8   :  { %v2077_v35 = vadd.f32 %v2073_v39, %v2063_v45  ;;  %v2079_v59 = vadd.f32 %v2073_v39, %v2065_v1  ;;  %v2081_v44 = vadd.f32 %v2073_v39, %v2067_v13  ;;  %v2083_v30 = vadd.f32 %v2073_v39, %v2069_v11 }
 0x6b9   :  { %v2084_v58 = vadd.f32 %v2076_v29, %v3257_v19  ;;  %v2086_v16 = vadd.f32 %v2078_v36, %v3258_v50  ;;  %v2088_v40 = vadd.f32 %v2080_v25, %v3259_v24  ;;  %v2090_v48 = vadd.f32 %v2082_v37, %v3260_v41 }
 0x6ba   :  { %v2085_v57 = vadd.f32 %v2077_v35, %v3261_v53  ;;  %v2087_v60 = vadd.f32 %v2079_v59, %v3262_v49  ;;  %v2089_v55 = vadd.f32 %v2081_v44, %v3263_v32  ;;  %v2091_v33 = vadd.f32 %v2083_v30, %v3264_v62 }
 0x6bb   :  { %v2092_v63 = vmax.f32 %v2084_v58, 0.0  ;;  %v2094_v26 = vmax.f32 %v2086_v16, 0.0  ;;  %v2096_v27 = vmax.f32 %v2088_v40, 0.0  ;;  %v2098_v10 = vmax.f32 %v2090_v48, 0.0 }
 0x6bc   :  { %v2093_v2 = vmax.f32 %v2085_v57, 0.0  ;;  %v2095_v54 = vmax.f32 %v2087_v60, 0.0  ;;  %v2097_v42 = vmax.f32 %v2089_v55, 0.0  ;;  %v2099_v34 = vmax.f32 %v2091_v33, 0.0 }
 0x6bd   :  { %2100 = vst [vmem:[#allocation8] sm:$0xff] %v2092_v63 }
 0x6be   :  { %2102 = vst [vmem:[#allocation8 + $0x10] sm:$0xff] %v2094_v26 }
 0x6bf   :  { %2104 = vst [vmem:[#allocation8 + $0x20] sm:$0xff] %v2096_v27 }
 0x6c0   :  { %2106 = vst [vmem:[#allocation8 + $0x30] sm:$0xff] %v2098_v10 }
 0x6c1   :  { %2101 = vst [vmem:[#allocation8 + $0x8] sm:$0xff] %v2093_v2 }
 0x6c2   :  { %2103 = vst [vmem:[#allocation8 + $0x18] sm:$0xff] %v2095_v54 }
 0x6c3   :  { %2105 = vst [vmem:[#allocation8 + $0x28] sm:$0xff] %v2097_v42 }
 0x6c4   :  { %2107 = vst [vmem:[#allocation8 + $0x38] sm:$0xff] %v2099_v34 }
 0x6c5   :  { %2120 = dma.vmem_to_hbm [thread:$0]  %s2113_s7, 1024, %s2115_s20, [#allocation5], %s2225_s25, %s2225_s25, %s2226_s26  }
 0x6c6   :  { %2222 = dma.done.wait [#allocation5], 1024  }
 0x6c7   :  { %2223 = vsyncadd [#allocation5], 4294966272 }
 0x6c8   :  { %2125 = vsyncpa [#allocation4], 1 }
 0x6c9   :  { %2126 = vsyncpa [#allocation7], 1 }
 0x6ca   :  { %2127 = vsyncpa [#allocation5], 1 }

</bundles_post_ra>
